<compile_context>
chip_gen: v5e
topology: v5e:2x2
jax: 0.10.0
libtpu: 0.0.40
codegen_flags: <defaults>
</compile_context>

<pallas_src>
import math

import jax
import jax.numpy as jnp
import numpy as np
from jax import lax
from jax.experimental import pallas as pl
from jax.experimental.pallas import tpu as pltpu

OBS_DIM = 4        # observable_dim
OUT_DIM = 4        # output_dim
LATENT = 32        # latent_dim
G3 = 3 * LATENT    # fused GRU gate width (96)
HEAD_W = 4 * LATENT     # fused head width (128)
HEAD_OUT = 4 * OUT_DIM  # fused head output width (16)
LN_EPS = 1e-5
LEAKY_SLOPE = 0.01

# ------------------------- packed "main" slab row layout ------------------------- #
R_WI, R_BI, R_BH = 0, 1, 2                       # GRU input weight / biases (1,96)
R_EOB, R_EOG, R_EOBT = 3, 4, 5                   # obs encoder bias / LN gamma / beta
R_EUB, R_EUG, R_EUBT = 6, 7, 8                   # unobs encoder bias / LN gamma / beta
R_UB, R_UG, R_UBT = 9, 10, 11                    # update bias / LN gamma / beta
R_HB1, R_HG1, R_HBT1 = 12, 13, 14                # head layer1 bias / gamma / beta (1,128)
R_HB2, R_HG2, R_HBT2 = 15, 16, 17                # head layer2 bias / gamma / beta (1,128)
R_HBO = 18                                       # head output bias (1,16)
R_WH = 19                                        # GRU recurrent Wh_cat (32,96)
R_EOW = R_WH + LATENT                            # obs encoder W (4,32)
R_EUW = R_EOW + OBS_DIM                          # unobs encoder W (4,32)
R_UW = R_EUW + OUT_DIM                           # update W (64,32): [wp; we]
N_MAIN = R_UW + 2 * LATENT                       # 123 rows total

# ------------------------- packed "head" slab row layout ------------------------- #
H_W1 = 0                        # packed layer-1 weight (64,128): zp->heads0,1 / zq->heads2,3
H_W2 = 2 * LATENT               # block-diag layer-2 weight (128,128)
H_AVG = H_W2 + HEAD_W           # block-diag segment-averaging matrix (128,128)
H_WO = H_AVG + HEAD_W           # block-diag output weight (128,16) (padded to 128 lanes)
N_HEAD = H_WO + HEAD_W          # 448 rows total


# ------------------------------------ kernel ------------------------------------- #
def rnn_filter_kernel(n_steps_ref, x_obs_ref, x_unobs_ref, main_ref, heads_ref,
                      out_heads_ref, z0_ref):
    TB_obs = x_obs_ref.shape[0]        # T_obs * B (flattened wrapper-side)
    TB_un = x_unobs_ref.shape[0]       # T_un * B
    B = z0_ref.shape[0]
    T_obs = TB_obs // B
    T_un = TB_un // B
    L = LATENT

    def leaky(x):
        return jnp.maximum(x, LEAKY_SLOPE * x)

    def layer_norm(x, g, beta):
        mu = jnp.mean(x, axis=-1, keepdims=True)
        var = jnp.mean(jnp.square(x - mu), axis=-1, keepdims=True)
        return (x - mu) * lax.rsqrt(var + LN_EPS) * g + beta

    def sigmoid(x):
        # exact rewrite: 1/(1+exp(-x)) == 0.5*(tanh(0.5*x)+1); single EUP op
        return 0.5 * (jnp.tanh(0.5 * x) + 1.0)

    # ---------------- batched pre-loop encoders (off the recurrence path) ----------
    enc_obs_w = main_ref[R_EOW:R_EOW + OBS_DIM, 0:L]
    enc_obs_b = main_ref[R_EOB:R_EOB + 1, 0:L]
    enc_obs_g = main_ref[R_EOG:R_EOG + 1, 0:L]
    enc_obs_bt = main_ref[R_EOBT:R_EOBT + 1, 0:L]

    enc_un_w = main_ref[R_EUW:R_EUW + OUT_DIM, 0:L]
    enc_un_b = main_ref[R_EUB:R_EUB + 1, 0:L]
    enc_un_g = main_ref[R_EUG:R_EUG + 1, 0:L]
    enc_un_bt = main_ref[R_EUBT:R_EUBT + 1, 0:L]

    ze_obs = leaky(layer_norm(
        jnp.dot(x_obs_ref[...], enc_obs_w, preferred_element_type=jnp.float32)
        + enc_obs_b, enc_obs_g, enc_obs_bt))                                 # (T_obs*B, 32)
    ze_un = leaky(layer_norm(
        jnp.dot(x_unobs_ref[...], enc_un_w, preferred_element_type=jnp.float32)
        + enc_un_b, enc_un_g, enc_un_bt))                                    # (T_un*B, 32)

    # update-layer params; evidence half of the update precomputed for every step
    upd_wp = main_ref[R_UW:R_UW + L, 0:L]
    upd_we = main_ref[R_UW + L:R_UW + 2 * L, 0:L]
    upd_b = main_ref[R_UB:R_UB + 1, 0:L]
    upd_g = main_ref[R_UG:R_UG + 1, 0:L]
    upd_bt = main_ref[R_UBT:R_UBT + 1, 0:L]
    upd_ev_obs = jnp.dot(ze_obs, upd_we, preferred_element_type=jnp.float32) + upd_b
    upd_ev_un = jnp.dot(ze_un, upd_we, preferred_element_type=jnp.float32) + upd_b

    # ---------------- GRU parameters (only these stay live across the loops) -------
    wi_cat = main_ref[R_WI:R_WI + 1, 0:G3]
    bi_cat = main_ref[R_BI:R_BI + 1, 0:G3]
    bh_cat = main_ref[R_BH:R_BH + 1, 0:G3]
    wh_cat = main_ref[R_WH:R_WH + L, 0:G3]

    def gru_rollout(h, n_steps):
        # RNNMultiStepModule: run the GRU n_steps times with scalar input t_i = 1..n.
        # Fused (B,32)x(32,96) recurrent matmul; t*Wi+bi carried as an accumulator.
        def body(_, carry):
            h_c, gx = carry
            gh = jnp.dot(h_c, wh_cat, preferred_element_type=jnp.float32) + bh_cat
            r = sigmoid(gx[:, 0:L] + gh[:, 0:L])
            zg = sigmoid(gx[:, L:2 * L] + gh[:, L:2 * L])
            n = jnp.tanh(gx[:, 2 * L:3 * L] + r * gh[:, 2 * L:3 * L])
            return ((1.0 - zg) * n + zg * h_c, gx + wi_cat)

        h_out, _ = lax.fori_loop(0, n_steps, body, (h, wi_cat + bi_cat))
        return h_out

    def update(zp, ev_pre):
        # Linear(concat([zp, ze])) -> LN -> LeakyReLU; ze half precomputed, no concat
        pre = jnp.dot(zp, upd_wp, preferred_element_type=jnp.float32) + ev_pre
        return leaky(layer_norm(pre, upd_g, upd_bt))

    z0 = jnp.zeros((B, L), dtype=jnp.float32)

    # --- encode_obs_trajectory warm-up (heads computed but discarded in the
    #     reference module, so skipped). Fully unrolled: T_obs is static. ---
    for i in range(T_obs):
        zp = gru_rollout(z0, n_steps_ref[i])
        z0 = update(zp, upd_ev_obs[i * B:(i + 1) * B])

    # --- estimation steps (mask=None -> every step takes the evidence branch);
    #     heads deferred to a single batched post-loop block. ---
    zp_list, zq_list = [], []
    for i in range(T_un):
        zp = gru_rollout(z0, n_steps_ref[T_obs + i])
        z0 = update(zp, upd_ev_un[i * B:(i + 1) * B])
        zp_list.append(zp)
        zq_list.append(z0)

    z0_ref[...] = z0

    # ---------------- batched post-loop heads (off the recurrence path) ------------
    zp_all = jnp.concatenate(zp_list, axis=0)                  # (T_un*B, 32)
    zq_all = jnp.concatenate(zq_list, axis=0)                  # (T_un*B, 32)
    hin = jnp.concatenate([zp_all, zq_all], axis=-1)           # (T_un*B, 64)

    hb1 = main_ref[R_HB1:R_HB1 + 1, :]
    hg1 = main_ref[R_HG1:R_HG1 + 1, :]
    hbt1 = main_ref[R_HBT1:R_HBT1 + 1, :]
    hb2 = main_ref[R_HB2:R_HB2 + 1, :]
    hg2 = main_ref[R_HG2:R_HG2 + 1, :]
    hbt2 = main_ref[R_HBT2:R_HBT2 + 1, :]
    hbo = main_ref[R_HBO:R_HBO + 1, 0:HEAD_OUT]
    avg = heads_ref[H_AVG:H_AVG + HEAD_W, :]                   # (128,128)

    def seg_ln(y, g, beta):
        # per-32-lane-segment LayerNorm via block-diagonal averaging matmul
        mu = jnp.dot(y, avg, preferred_element_type=jnp.float32)
        d = y - mu
        var = jnp.dot(d * d, avg, preferred_element_type=jnp.float32)
        return d * lax.rsqrt(var + LN_EPS) * g + beta

    y = jnp.dot(hin, heads_ref[H_W1:H_W1 + 2 * L, :],
                preferred_element_type=jnp.float32) + hb1      # (T_un*B, 128)
    y = leaky(seg_ln(y, hg1, hbt1))
    y = jnp.dot(y, heads_ref[H_W2:H_W2 + HEAD_W, :],
                preferred_element_type=jnp.float32) + hb2
    y = leaky(seg_ln(y, hg2, hbt2))
    out = jnp.dot(y, heads_ref[H_WO:H_WO + HEAD_W, 0:HEAD_OUT],
                  preferred_element_type=jnp.float32) + hbo    # (T_un*B, 16)
    out_heads_ref[...] = out                                   # one contiguous store


# ----------------------------- wrapper-side packing ------------------------------- #
def pack_params(p):
    def pad_lanes(x, width=HEAD_W):
        return jnp.pad(x, ((0, 0), (0, width - x.shape[1])))

    wi_cat = jnp.concatenate([p["gru_wir"], p["gru_wiz"], p["gru_win"]], axis=1)  # (1,96)
    bi_cat = jnp.concatenate([p["gru_bir"], p["gru_biz"], p["gru_bin"]], axis=1)
    bh_cat = jnp.concatenate([p["gru_bhr"], p["gru_bhz"], p["gru_bhn"]], axis=1)
    wh_cat = jnp.concatenate([p["gru_whr"], p["gru_whz"], p["gru_whn"]], axis=1)  # (32,96)
    upd_w = jnp.concatenate([p["upd_wp"], p["upd_we"]], axis=0)                   # (64,32)

    def hrow(name):  # (4,1,d) -> (1,4d)
        return jnp.concatenate([p[name][k] for k in range(4)], axis=1)

    rows = [
        pad_lanes(wi_cat), pad_lanes(bi_cat), pad_lanes(bh_cat),
        pad_lanes(p["enc_obs_b"]), pad_lanes(p["enc_obs_g"]), pad_lanes(p["enc_obs_beta"]),
        pad_lanes(p["enc_un_b"]), pad_lanes(p["enc_un_g"]), pad_lanes(p["enc_un_beta"]),
        pad_lanes(p["upd_b"]), pad_lanes(p["upd_g"]), pad_lanes(p["upd_beta"]),
        hrow("head_b1"), hrow("head_g1"), hrow("head_beta1"),
        hrow("head_b2"), hrow("head_g2"), hrow("head_beta2"),
        pad_lanes(hrow("head_bo")),
        pad_lanes(wh_cat), pad_lanes(p["enc_obs_w"]), pad_lanes(p["enc_un_w"]),
        pad_lanes(upd_w),
    ]
    slab_main = jnp.concatenate(rows, axis=0)
    assert slab_main.shape == (N_MAIN, HEAD_W)

    # layer-1 weight packed so the head input is just concat([zp, zq]) (64 lanes):
    # rows 0:32 (zp) feed heads 0,1; rows 32:64 (zq) feed heads 2,3.
    w1p = jnp.zeros((2 * LATENT, HEAD_W), jnp.float32)
    w1p = w1p.at[0:LATENT, 0:LATENT].set(p["head_w1"][0])
    w1p = w1p.at[0:LATENT, LATENT:2 * LATENT].set(p["head_w1"][1])
    w1p = w1p.at[LATENT:2 * LATENT, 2 * LATENT:3 * LATENT].set(p["head_w1"][2])
    w1p = w1p.at[LATENT:2 * LATENT, 3 * LATENT:4 * LATENT].set(p["head_w1"][3])

    def block_diag4(blocks):
        n = blocks[0].shape[1]
        out = jnp.zeros((HEAD_W, 4 * n), jnp.float32)
        for k, b in enumerate(blocks):
            out = out.at[LATENT * k:LATENT * (k + 1), n * k:n * (k + 1)].set(b)
        return out

    w2_bd = block_diag4([p["head_w2"][k] for k in range(4)])   # (128,128)
    wo_bd = block_diag4([p["head_wo"][k] for k in range(4)])   # (128,16)
    avg = jnp.kron(jnp.eye(4, dtype=jnp.float32),
                   jnp.full((LATENT, LATENT), 1.0 / LATENT, jnp.float32))  # (128,128)
    slab_heads = jnp.concatenate([w1p, w2_bd, avg, pad_lanes(wo_bd)], axis=0)
    assert slab_heads.shape == (N_HEAD, HEAD_W)
    return slab_main, slab_heads


def rnn_filter_forward(params, x_obs, t_obs, x_unobs, t_unobs):
    T_obs, B, _ = x_obs.shape
    T_un = x_unobs.shape[0]

    # Number of GRU roll-out steps per filter step: round(t1[0,0] - t0[0,0]),
    # with t0 initialized to 0 (exactly what RNNMultiStepModule does with t[0,0,0]).
    # TODO(synk): jnp.round is banker's rounding (same as Python round()); half-integer
    # time deltas are assumed not to occur.
    t_seq = jnp.concatenate(
        [jnp.zeros((1,), jnp.float32), t_obs[:, 0, 0], t_unobs[:, 0, 0]])
    n_steps = jnp.round(t_seq[1:] - t_seq[:-1]).astype(jnp.int32)  # (T_obs + T_un,)

    slab_main, slab_heads = pack_params(params)
    x_obs_flat = x_obs.reshape(T_obs * B, OBS_DIM)
    x_unobs_flat = x_unobs.reshape(T_un * B, OUT_DIM)

    out_shape = (
        jax.ShapeDtypeStruct((T_un * B, HEAD_OUT), jnp.float32),  # fused head outputs
        jax.ShapeDtypeStruct((B, LATENT), jnp.float32),           # z0 (final latent)
    )
    in_specs = [
        pl.BlockSpec(memory_space=pltpu.MemorySpace.SMEM),   # n_steps
        pl.BlockSpec(memory_space=pltpu.MemorySpace.VMEM),   # x_obs (flattened)
        pl.BlockSpec(memory_space=pltpu.MemorySpace.VMEM),   # x_unobs (flattened)
        pl.BlockSpec(memory_space=pltpu.MemorySpace.VMEM),   # slab_main
        pl.BlockSpec(memory_space=pltpu.MemorySpace.VMEM),   # slab_heads
    ]
    out_specs = (pl.BlockSpec(memory_space=pltpu.MemorySpace.VMEM),
                 pl.BlockSpec(memory_space=pltpu.MemorySpace.VMEM))

    heads, z0 = pl.pallas_call(
        rnn_filter_kernel,
        out_shape=out_shape,
        in_specs=in_specs,
        out_specs=out_specs,
    )(n_steps, x_obs_flat, x_unobs_flat, slab_main, slab_heads)

    heads = heads.reshape(T_un, B, HEAD_OUT)
    priors_mean = heads[..., 0:OUT_DIM]
    priors_log_var = heads[..., OUT_DIM:2 * OUT_DIM]
    post_mean = heads[..., 2 * OUT_DIM:3 * OUT_DIM]
    post_log_var = heads[..., 3 * OUT_DIM:4 * OUT_DIM]
    return priors_mean, priors_log_var, post_mean, post_log_var, z0


# --------------------------------- parameter init --------------------------------- #
def _uniform(key, shape, bound):
    return jax.random.uniform(key, shape, jnp.float32, -bound, bound)


def init_params(key):
    p = {}
    keys = iter(jax.random.split(key, 64))

    def nxt():
        return next(keys)

    def linear_params(in_dim, out_dim):
        k = 1.0 / math.sqrt(in_dim)
        return _uniform(nxt(), (in_dim, out_dim), k), _uniform(nxt(), (1, out_dim), k)

    # obs2latent / unobs2latent: MLP(in, L, L, n_layers=1)
    for name, in_dim in (("enc_obs", OBS_DIM), ("enc_un", OUT_DIM)):
        w, b = linear_params(in_dim, LATENT)
        p[f"{name}_w"], p[f"{name}_b"] = w, b
        p[f"{name}_g"] = jnp.ones((1, LATENT), jnp.float32)
        p[f"{name}_beta"] = jnp.zeros((1, LATENT), jnp.float32)

    # GRU (input_size=1, hidden=LATENT, 1 layer), per-gate split
    kg = 1.0 / math.sqrt(LATENT)
    for gate in ("r", "z", "n"):
        p[f"gru_wi{gate}"] = _uniform(nxt(), (1, LATENT), kg)
        p[f"gru_wh{gate}"] = _uniform(nxt(), (LATENT, LATENT), kg)
        p[f"gru_bi{gate}"] = _uniform(nxt(), (1, LATENT), kg)
        p[f"gru_bh{gate}"] = _uniform(nxt(), (1, LATENT), kg)

    # update MLP: Linear(2L, L) -> LN -> LeakyReLU, split Linear into two halves
    ku = 1.0 / math.sqrt(2 * LATENT)
    p["upd_wp"] = _uniform(nxt(), (LATENT, LATENT), ku)
    p["upd_we"] = _uniform(nxt(), (LATENT, LATENT), ku)
    p["upd_b"] = _uniform(nxt(), (1, LATENT), ku)
    p["upd_g"] = jnp.ones((1, LATENT), jnp.float32)
    p["upd_beta"] = jnp.zeros((1, LATENT), jnp.float32)

    # 4 heads: MLP(L, L, n_layers=2) + Linear(L, OUT_DIM)
    w1, b1, w2, b2, wo, bo = [], [], [], [], [], []
    for _ in range(4):
        w, b = linear_params(LATENT, LATENT); w1.append(w); b1.append(b)
        w, b = linear_params(LATENT, LATENT); w2.append(w); b2.append(b)
        w, b = linear_params(LATENT, OUT_DIM); wo.append(w); bo.append(b)
    p["head_w1"], p["head_b1"] = jnp.stack(w1), jnp.stack(b1)
    p["head_g1"] = jnp.ones((4, 1, LATENT), jnp.float32)
    p["head_beta1"] = jnp.zeros((4, 1, LATENT), jnp.float32)
    p["head_w2"], p["head_b2"] = jnp.stack(w2), jnp.stack(b2)
    p["head_g2"] = jnp.ones((4, 1, LATENT), jnp.float32)
    p["head_beta2"] = jnp.zeros((4, 1, LATENT), jnp.float32)
    p["head_wo"], p["head_bo"] = jnp.stack(wo), jnp.stack(bo)
    return p


# ------------------------------- plain-JAX reference ------------------------------- #
def reference_forward(p, x_obs, x_unobs, n_steps_list):
    def mlp_layer(x, w, b, g, beta):
        y = x @ w + b
        mu = y.mean(-1, keepdims=True)
        var = ((y - mu) ** 2).mean(-1, keepdims=True)
        y = (y - mu) / jnp.sqrt(var + LN_EPS) * g + beta
        return jnp.where(y >= 0, y, LEAKY_SLOPE * y)

    def gru_rollout(h, n_steps):
        for s in range(1, int(n_steps) + 1):
            t = float(s)
            r = jax.nn.sigmoid(t * p["gru_wir"] + p["gru_bir"] + h @ p["gru_whr"] + p["gru_bhr"])
            zg = jax.nn.sigmoid(t * p["gru_wiz"] + p["gru_biz"] + h @ p["gru_whz"] + p["gru_bhz"])
            n = jnp.tanh(t * p["gru_win"] + p["gru_bin"] + r * (h @ p["gru_whn"] + p["gru_bhn"]))
            h = (1.0 - zg) * n + zg * h
        return h

    def update(zp, ze):
        pre = zp @ p["upd_wp"] + ze @ p["upd_we"] + p["upd_b"]
        mu = pre.mean(-1, keepdims=True)
        var = ((pre - mu) ** 2).mean(-1, keepdims=True)
        y = (pre - mu) / jnp.sqrt(var + LN_EPS) * p["upd_g"] + p["upd_beta"]
        return jnp.where(y >= 0, y, LEAKY_SLOPE * y)

    def head(x, idx):
        y = mlp_layer(x, p["head_w1"][idx], p["head_b1"][idx], p["head_g1"][idx], p["head_beta1"][idx])
        y = mlp_layer(y, p["head_w2"][idx], p["head_b2"][idx], p["head_g2"][idx], p["head_beta2"][idx])
        return y @ p["head_wo"][idx] + p["head_bo"][idx]

    T_obs, B, _ = x_obs.shape
    T_un = x_unobs.shape[0]
    z0 = jnp.zeros((B, LATENT), jnp.float32)
    for i in range(T_obs):
        ze = mlp_layer(x_obs[i], p["enc_obs_w"], p["enc_obs_b"], p["enc_obs_g"], p["enc_obs_beta"])
        zp = gru_rollout(z0, n_steps_list[i])
        z0 = update(zp, ze)
    pm, plv, qm, qlv = [], [], [], []
    for i in range(T_un):
        ze = mlp_layer(x_unobs[i], p["enc_un_w"], p["enc_un_b"], p["enc_un_g"], p["enc_un_beta"])
        zp = gru_rollout(z0, n_steps_list[T_obs + i])
        pm.append(head(zp, 0))
        plv.append(head(zp, 1))
        z0 = update(zp, ze)
        qm.append(head(z0, 2))
        qlv.append(head(z0, 3))
    return (jnp.stack(pm), jnp.stack(plv), jnp.stack(qm), jnp.stack(qlv), z0)


# --------------------------------------- main --------------------------------------- #
if __name__ == "__main__":
    key = jax.random.PRNGKey(0)
    kp, kx1, kx2 = jax.random.split(key, 3)
    params = init_params(kp)

    T_obs, T_un, B = 4, 2, 2
    x_obs = jax.random.normal(kx1, (T_obs, B, OBS_DIM), jnp.float32)
    x_unobs = jax.random.normal(kx2, (T_un, B, OUT_DIM), jnp.float32)
    # increasing observation times; last unobs delta = 2 to exercise a 2-step GRU rollout
    t_obs = jnp.broadcast_to(
        jnp.arange(1, T_obs + 1, dtype=jnp.float32)[:, None, None], (T_obs, B, 1))
    t_unobs = jnp.broadcast_to(
        jnp.array([T_obs + 1.0, T_obs + 3.0], jnp.float32)[:, None, None], (T_un, B, 1))

    outs = rnn_filter_forward(params, x_obs, t_obs, x_unobs, t_unobs)
    outs = jax.block_until_ready(outs)

    # sanity check against a plain-JAX reference (unpacked params)
    t_seq = np.concatenate(
        [[0.0], np.asarray(t_obs)[:, 0, 0], np.asarray(t_unobs)[:, 0, 0]])
    n_steps_list = [int(round(float(d))) for d in np.diff(t_seq)]
    refs = reference_forward(params, x_obs, x_unobs, n_steps_list)
    for o, r in zip(outs, refs):
        assert o.shape == r.shape and o.dtype == r.dtype
        assert jnp.allclose(o, r, atol=2e-3, rtol=2e-3), float(jnp.max(jnp.abs(o - r)))

    print("KERNEL_OK")
</pallas_src>

<mosaic_0001>
module attributes {stable_mosaic.version = 11 : i64} {
  func.func @rnn_filter_kernel(%arg0: memref<6xi32, #tpu.memory_space<smem>>, %arg1: memref<8x4xf32, #tpu.memory_space<vmem>>, %arg2: memref<4x4xf32, #tpu.memory_space<vmem>>, %arg3: memref<123x128xf32, #tpu.memory_space<vmem>>, %arg4: memref<448x128xf32, #tpu.memory_space<vmem>>, %arg5: memref<4x16xf32, #tpu.memory_space<vmem>>, %arg6: memref<2x32xf32, #tpu.memory_space<vmem>>) attributes {dimension_semantics = [], scalar_prefetch = 0 : i64, scratch_operands = 0 : i64, tpu.core_type = #tpu.core_type<tc>} {
    %c51 = arith.constant 51 : index
    %c0 = arith.constant 0 : index
    %0 = vector.load %arg3[%c51, %c0] : memref<123x128xf32, #tpu.memory_space<vmem>>, vector<4x32xf32>
    %c3 = arith.constant 3 : index
    %c0_0 = arith.constant 0 : index
    %1 = vector.load %arg3[%c3, %c0_0] : memref<123x128xf32, #tpu.memory_space<vmem>>, vector<1x32xf32>
    %c4 = arith.constant 4 : index
    %c0_1 = arith.constant 0 : index
    %2 = vector.load %arg3[%c4, %c0_1] : memref<123x128xf32, #tpu.memory_space<vmem>>, vector<1x32xf32>
    %c5 = arith.constant 5 : index
    %c0_2 = arith.constant 0 : index
    %3 = vector.load %arg3[%c5, %c0_2] : memref<123x128xf32, #tpu.memory_space<vmem>>, vector<1x32xf32>
    %c55 = arith.constant 55 : index
    %c0_3 = arith.constant 0 : index
    %4 = vector.load %arg3[%c55, %c0_3] : memref<123x128xf32, #tpu.memory_space<vmem>>, vector<4x32xf32>
    %c6 = arith.constant 6 : index
    %c0_4 = arith.constant 0 : index
    %5 = vector.load %arg3[%c6, %c0_4] : memref<123x128xf32, #tpu.memory_space<vmem>>, vector<1x32xf32>
    %c7 = arith.constant 7 : index
    %c0_5 = arith.constant 0 : index
    %6 = vector.load %arg3[%c7, %c0_5] : memref<123x128xf32, #tpu.memory_space<vmem>>, vector<1x32xf32>
    %c8 = arith.constant 8 : index
    %c0_6 = arith.constant 0 : index
    %7 = vector.load %arg3[%c8, %c0_6] : memref<123x128xf32, #tpu.memory_space<vmem>>, vector<1x32xf32>
    %c0_7 = arith.constant 0 : index
    %c0_8 = arith.constant 0 : index
    %8 = vector.load %arg1[%c0_7, %c0_8] : memref<8x4xf32, #tpu.memory_space<vmem>>, vector<8x4xf32>
    %cst = arith.constant dense<0.000000e+00> : vector<8x32xf32>
    %9 = tpu.matmul %8, %0, %cst {dimension_numbers = #tpu.dot_dimension_numbers<[1], [0], [0], [1], [0, 0, 1, 1], [], []>} : vector<8x4xf32>, vector<4x32xf32>, vector<8x32xf32> -> vector<8x32xf32>
    %10 = vector.broadcast %1 : vector<1x32xf32> to vector<8x32xf32>
    %11 = arith.addf %9, %10 : vector<8x32xf32>
    %cst_9 = arith.constant dense<0.000000e+00> : vector<8xf32>
    %12 = vector.multi_reduction <add>, %11, %cst_9 [1] : vector<8x32xf32> to vector<8xf32>
    %13 = vector.shape_cast %12 : vector<8xf32> to vector<8x1xf32>
    %cst_10 = arith.constant 3.200000e+01 : f32
    %14 = vector.broadcast %cst_10 : f32 to vector<8x1xf32>
    %15 = arith.divf %13, %14 : vector<8x1xf32>
    %16 = vector.broadcast %15 : vector<8x1xf32> to vector<8x32xf32>
    %17 = arith.subf %11, %16 : vector<8x32xf32>
    %18 = arith.mulf %17, %17 : vector<8x32xf32>
    %cst_11 = arith.constant dense<0.000000e+00> : vector<8xf32>
    %19 = vector.multi_reduction <add>, %18, %cst_11 [1] : vector<8x32xf32> to vector<8xf32>
    %20 = vector.shape_cast %19 : vector<8xf32> to vector<8x1xf32>
    %cst_12 = arith.constant 3.200000e+01 : f32
    %21 = vector.broadcast %cst_12 : f32 to vector<8x1xf32>
    %22 = arith.divf %20, %21 : vector<8x1xf32>
    %23 = vector.broadcast %15 : vector<8x1xf32> to vector<8x32xf32>
    %24 = arith.subf %11, %23 : vector<8x32xf32>
    %cst_13 = arith.constant 9.99999974E-6 : f32
    %25 = vector.broadcast %cst_13 : f32 to vector<8x1xf32>
    %26 = arith.addf %22, %25 : vector<8x1xf32>
    %27 = math.rsqrt %26 : vector<8x1xf32>
    %28 = vector.broadcast %27 : vector<8x1xf32> to vector<8x32xf32>
    %29 = arith.mulf %24, %28 : vector<8x32xf32>
    %30 = vector.broadcast %2 : vector<1x32xf32> to vector<8x32xf32>
    %31 = arith.mulf %29, %30 : vector<8x32xf32>
    %32 = vector.broadcast %3 : vector<1x32xf32> to vector<8x32xf32>
    %33 = arith.addf %31, %32 : vector<8x32xf32>
    %cst_14 = arith.constant 0.00999999977 : f32
    %34 = vector.broadcast %cst_14 : f32 to vector<8x32xf32>
    %35 = arith.mulf %34, %33 : vector<8x32xf32>
    %36 = arith.maximumf %33, %35 : vector<8x32xf32>
    %c0_15 = arith.constant 0 : index
    %c0_16 = arith.constant 0 : index
    %37 = vector.load %arg2[%c0_15, %c0_16] : memref<4x4xf32, #tpu.memory_space<vmem>>, vector<4x4xf32>
    %cst_17 = arith.constant dense<0.000000e+00> : vector<4x32xf32>
    %38 = tpu.matmul %37, %4, %cst_17 {dimension_numbers = #tpu.dot_dimension_numbers<[1], [0], [0], [1], [0, 0, 1, 1], [], []>} : vector<4x4xf32>, vector<4x32xf32>, vector<4x32xf32> -> vector<4x32xf32>
    %39 = vector.broadcast %5 : vector<1x32xf32> to vector<4x32xf32>
    %40 = arith.addf %38, %39 : vector<4x32xf32>
    %cst_18 = arith.constant dense<0.000000e+00> : vector<4xf32>
    %41 = vector.multi_reduction <add>, %40, %cst_18 [1] : vector<4x32xf32> to vector<4xf32>
    %42 = vector.shape_cast %41 : vector<4xf32> to vector<4x1xf32>
    %cst_19 = arith.constant 3.200000e+01 : f32
    %43 = vector.broadcast %cst_19 : f32 to vector<4x1xf32>
    %44 = arith.divf %42, %43 : vector<4x1xf32>
    %45 = vector.broadcast %44 : vector<4x1xf32> to vector<4x32xf32>
    %46 = arith.subf %40, %45 : vector<4x32xf32>
    %47 = arith.mulf %46, %46 : vector<4x32xf32>
    %cst_20 = arith.constant dense<0.000000e+00> : vector<4xf32>
    %48 = vector.multi_reduction <add>, %47, %cst_20 [1] : vector<4x32xf32> to vector<4xf32>
    %49 = vector.shape_cast %48 : vector<4xf32> to vector<4x1xf32>
    %cst_21 = arith.constant 3.200000e+01 : f32
    %50 = vector.broadcast %cst_21 : f32 to vector<4x1xf32>
    %51 = arith.divf %49, %50 : vector<4x1xf32>
    %52 = vector.broadcast %44 : vector<4x1xf32> to vector<4x32xf32>
    %53 = arith.subf %40, %52 : vector<4x32xf32>
    %cst_22 = arith.constant 9.99999974E-6 : f32
    %54 = vector.broadcast %cst_22 : f32 to vector<4x1xf32>
    %55 = arith.addf %51, %54 : vector<4x1xf32>
    %56 = math.rsqrt %55 : vector<4x1xf32>
    %57 = vector.broadcast %56 : vector<4x1xf32> to vector<4x32xf32>
    %58 = arith.mulf %53, %57 : vector<4x32xf32>
    %59 = vector.broadcast %6 : vector<1x32xf32> to vector<4x32xf32>
    %60 = arith.mulf %58, %59 : vector<4x32xf32>
    %61 = vector.broadcast %7 : vector<1x32xf32> to vector<4x32xf32>
    %62 = arith.addf %60, %61 : vector<4x32xf32>
    %cst_23 = arith.constant 0.00999999977 : f32
    %63 = vector.broadcast %cst_23 : f32 to vector<4x32xf32>
    %64 = arith.mulf %63, %62 : vector<4x32xf32>
    %65 = arith.maximumf %62, %64 : vector<4x32xf32>
    %c59 = arith.constant 59 : index
    %c0_24 = arith.constant 0 : index
    %66 = vector.load %arg3[%c59, %c0_24] : memref<123x128xf32, #tpu.memory_space<vmem>>, vector<32x32xf32>
    %c91 = arith.constant 91 : index
    %c0_25 = arith.constant 0 : index
    %67 = vector.load %arg3[%c91, %c0_25] : memref<123x128xf32, #tpu.memory_space<vmem>>, vector<32x32xf32>
    %c9 = arith.constant 9 : index
    %c0_26 = arith.constant 0 : index
    %68 = vector.load %arg3[%c9, %c0_26] : memref<123x128xf32, #tpu.memory_space<vmem>>, vector<1x32xf32>
    %c10 = arith.constant 10 : index
    %c0_27 = arith.constant 0 : index
    %69 = vector.load %arg3[%c10, %c0_27] : memref<123x128xf32, #tpu.memory_space<vmem>>, vector<1x32xf32>
    %c11 = arith.constant 11 : index
    %c0_28 = arith.constant 0 : index
    %70 = vector.load %arg3[%c11, %c0_28] : memref<123x128xf32, #tpu.memory_space<vmem>>, vector<1x32xf32>
    %cst_29 = arith.constant dense<0.000000e+00> : vector<8x32xf32>
    %71 = tpu.matmul %36, %67, %cst_29 {dimension_numbers = #tpu.dot_dimension_numbers<[1], [0], [0], [1], [0, 0, 1, 1], [], []>} : vector<8x32xf32>, vector<32x32xf32>, vector<8x32xf32> -> vector<8x32xf32>
    %72 = vector.broadcast %68 : vector<1x32xf32> to vector<8x32xf32>
    %73 = arith.addf %71, %72 : vector<8x32xf32>
    %cst_30 = arith.constant dense<0.000000e+00> : vector<4x32xf32>
    %74 = tpu.matmul %65, %67, %cst_30 {dimension_numbers = #tpu.dot_dimension_numbers<[1], [0], [0], [1], [0, 0, 1, 1], [], []>} : vector<4x32xf32>, vector<32x32xf32>, vector<4x32xf32> -> vector<4x32xf32>
    %75 = vector.broadcast %68 : vector<1x32xf32> to vector<4x32xf32>
    %76 = arith.addf %74, %75 : vector<4x32xf32>
    %c0_31 = arith.constant 0 : index
    %c0_32 = arith.constant 0 : index
    %77 = vector.load %arg3[%c0_31, %c0_32] : memref<123x128xf32, #tpu.memory_space<vmem>>, vector<1x96xf32>
    %c1 = arith.constant 1 : index
    %c0_33 = arith.constant 0 : index
    %78 = vector.load %arg3[%c1, %c0_33] : memref<123x128xf32, #tpu.memory_space<vmem>>, vector<1x96xf32>
    %c2 = arith.constant 2 : index
    %c0_34 = arith.constant 0 : index
    %79 = vector.load %arg3[%c2, %c0_34] : memref<123x128xf32, #tpu.memory_space<vmem>>, vector<1x96xf32>
    %c19 = arith.constant 19 : index
    %c0_35 = arith.constant 0 : index
    %80 = vector.load %arg3[%c19, %c0_35] : memref<123x128xf32, #tpu.memory_space<vmem>>, vector<32x96xf32>
    %cst_36 = arith.constant 0.000000e+00 : f32
    %81 = vector.broadcast %cst_36 : f32 to vector<2x32xf32>
    %c0_37 = arith.constant 0 : index
    %82 = memref.load %arg0[%c0_37] : memref<6xi32, #tpu.memory_space<smem>>
    %83 = arith.addf %77, %78 : vector<1x96xf32>
    %c0_i32 = arith.constant 0 : i32
    %84 = arith.subi %82, %c0_i32 : i32
    %85 = arith.addi %c0_i32, %84 : i32
    %c1_i32 = arith.constant 1 : i32
    %86:2 = scf.for %arg7 = %c0_i32 to %85 step %c1_i32 iter_args(%arg8 = %81, %arg9 = %83) -> (vector<2x32xf32>, vector<1x96xf32>)  : i32 {
      %cst_122 = arith.constant dense<0.000000e+00> : vector<2x96xf32>
      %335 = tpu.matmul %arg8, %80, %cst_122 {dimension_numbers = #tpu.dot_dimension_numbers<[1], [0], [0], [1], [0, 0, 1, 1], [], []>} : vector<2x32xf32>, vector<32x96xf32>, vector<2x96xf32> -> vector<2x96xf32>
      %336 = vector.broadcast %79 : vector<1x96xf32> to vector<2x96xf32>
      %337 = arith.addf %335, %336 : vector<2x96xf32>
      %338 = vector.extract_strided_slice %arg9 {offsets = [0, 0], sizes = [1, 32], strides = [1, 1]} : vector<1x96xf32> to vector<1x32xf32>
      %339 = vector.extract_strided_slice %337 {offsets = [0, 0], sizes = [2, 32], strides = [1, 1]} : vector<2x96xf32> to vector<2x32xf32>
      %340 = vector.broadcast %338 : vector<1x32xf32> to vector<2x32xf32>
      %341 = arith.addf %340, %339 : vector<2x32xf32>
      %cst_123 = arith.constant 5.000000e-01 : f32
      %342 = vector.broadcast %cst_123 : f32 to vector<2x32xf32>
      %343 = arith.mulf %342, %341 : vector<2x32xf32>
      %344 = math.tanh %343 : vector<2x32xf32>
      %cst_124 = arith.constant 1.000000e+00 : f32
      %345 = vector.broadcast %cst_124 : f32 to vector<2x32xf32>
      %346 = arith.addf %344, %345 : vector<2x32xf32>
      %cst_125 = arith.constant 5.000000e-01 : f32
      %347 = vector.broadcast %cst_125 : f32 to vector<2x32xf32>
      %348 = arith.mulf %347, %346 : vector<2x32xf32>
      %349 = vector.extract_strided_slice %arg9 {offsets = [0, 32], sizes = [1, 32], strides = [1, 1]} : vector<1x96xf32> to vector<1x32xf32>
      %350 = vector.extract_strided_slice %337 {offsets = [0, 32], sizes = [2, 32], strides = [1, 1]} : vector<2x96xf32> to vector<2x32xf32>
      %351 = vector.broadcast %349 : vector<1x32xf32> to vector<2x32xf32>
      %352 = arith.addf %351, %350 : vector<2x32xf32>
      %cst_126 = arith.constant 5.000000e-01 : f32
      %353 = vector.broadcast %cst_126 : f32 to vector<2x32xf32>
      %354 = arith.mulf %353, %352 : vector<2x32xf32>
      %355 = math.tanh %354 : vector<2x32xf32>
      %cst_127 = arith.constant 1.000000e+00 : f32
      %356 = vector.broadcast %cst_127 : f32 to vector<2x32xf32>
      %357 = arith.addf %355, %356 : vector<2x32xf32>
      %cst_128 = arith.constant 5.000000e-01 : f32
      %358 = vector.broadcast %cst_128 : f32 to vector<2x32xf32>
      %359 = arith.mulf %358, %357 : vector<2x32xf32>
      %360 = vector.extract_strided_slice %arg9 {offsets = [0, 64], sizes = [1, 32], strides = [1, 1]} : vector<1x96xf32> to vector<1x32xf32>
      %361 = vector.extract_strided_slice %337 {offsets = [0, 64], sizes = [2, 32], strides = [1, 1]} : vector<2x96xf32> to vector<2x32xf32>
      %362 = arith.mulf %348, %361 : vector<2x32xf32>
      %363 = vector.broadcast %360 : vector<1x32xf32> to vector<2x32xf32>
      %364 = arith.addf %363, %362 : vector<2x32xf32>
      %365 = math.tanh %364 : vector<2x32xf32>
      %cst_129 = arith.constant 1.000000e+00 : f32
      %366 = vector.broadcast %cst_129 : f32 to vector<2x32xf32>
      %367 = arith.subf %366, %359 : vector<2x32xf32>
      %368 = arith.mulf %367, %365 : vector<2x32xf32>
      %369 = arith.mulf %359, %arg8 : vector<2x32xf32>
      %370 = arith.addf %368, %369 : vector<2x32xf32>
      %371 = arith.addf %arg9, %77 : vector<1x96xf32>
      scf.yield %370, %371 : vector<2x32xf32>, vector<1x96xf32>
    }
    %87 = vector.extract_strided_slice %73 {offsets = [0, 0], sizes = [2, 32], strides = [1, 1]} : vector<8x32xf32> to vector<2x32xf32>
    %cst_38 = arith.constant dense<0.000000e+00> : vector<2x32xf32>
    %88 = tpu.matmul %86#0, %66, %cst_38 {dimension_numbers = #tpu.dot_dimension_numbers<[1], [0], [0], [1], [0, 0, 1, 1], [], []>} : vector<2x32xf32>, vector<32x32xf32>, vector<2x32xf32> -> vector<2x32xf32>
    %89 = arith.addf %88, %87 : vector<2x32xf32>
    %cst_39 = arith.constant dense<0.000000e+00> : vector<2xf32>
    %90 = vector.multi_reduction <add>, %89, %cst_39 [1] : vector<2x32xf32> to vector<2xf32>
    %91 = vector.shape_cast %90 : vector<2xf32> to vector<2x1xf32>
    %cst_40 = arith.constant 3.200000e+01 : f32
    %92 = vector.broadcast %cst_40 : f32 to vector<2x1xf32>
    %93 = arith.divf %91, %92 : vector<2x1xf32>
    %94 = vector.broadcast %93 : vector<2x1xf32> to vector<2x32xf32>
    %95 = arith.subf %89, %94 : vector<2x32xf32>
    %96 = arith.mulf %95, %95 : vector<2x32xf32>
    %cst_41 = arith.constant dense<0.000000e+00> : vector<2xf32>
    %97 = vector.multi_reduction <add>, %96, %cst_41 [1] : vector<2x32xf32> to vector<2xf32>
    %98 = vector.shape_cast %97 : vector<2xf32> to vector<2x1xf32>
    %cst_42 = arith.constant 3.200000e+01 : f32
    %99 = vector.broadcast %cst_42 : f32 to vector<2x1xf32>
    %100 = arith.divf %98, %99 : vector<2x1xf32>
    %101 = vector.broadcast %93 : vector<2x1xf32> to vector<2x32xf32>
    %102 = arith.subf %89, %101 : vector<2x32xf32>
    %cst_43 = arith.constant 9.99999974E-6 : f32
    %103 = vector.broadcast %cst_43 : f32 to vector<2x1xf32>
    %104 = arith.addf %100, %103 : vector<2x1xf32>
    %105 = math.rsqrt %104 : vector<2x1xf32>
    %106 = vector.broadcast %105 : vector<2x1xf32> to vector<2x32xf32>
    %107 = arith.mulf %102, %106 : vector<2x32xf32>
    %108 = vector.broadcast %69 : vector<1x32xf32> to vector<2x32xf32>
    %109 = arith.mulf %107, %108 : vector<2x32xf32>
    %110 = vector.broadcast %70 : vector<1x32xf32> to vector<2x32xf32>
    %111 = arith.addf %109, %110 : vector<2x32xf32>
    %cst_44 = arith.constant 0.00999999977 : f32
    %112 = vector.broadcast %cst_44 : f32 to vector<2x32xf32>
    %113 = arith.mulf %112, %111 : vector<2x32xf32>
    %114 = arith.maximumf %111, %113 : vector<2x32xf32>
    %c1_45 = arith.constant 1 : index
    %115 = memref.load %arg0[%c1_45] : memref<6xi32, #tpu.memory_space<smem>>
    %116 = arith.addf %77, %78 : vector<1x96xf32>
    %c0_i32_46 = arith.constant 0 : i32
    %117 = arith.subi %115, %c0_i32_46 : i32
    %118 = arith.addi %c0_i32_46, %117 : i32
    %c1_i32_47 = arith.constant 1 : i32
    %119:2 = scf.for %arg7 = %c0_i32_46 to %118 step %c1_i32_47 iter_args(%arg8 = %114, %arg9 = %116) -> (vector<2x32xf32>, vector<1x96xf32>)  : i32 {
      %cst_122 = arith.constant dense<0.000000e+00> : vector<2x96xf32>
      %335 = tpu.matmul %arg8, %80, %cst_122 {dimension_numbers = #tpu.dot_dimension_numbers<[1], [0], [0], [1], [0, 0, 1, 1], [], []>} : vector<2x32xf32>, vector<32x96xf32>, vector<2x96xf32> -> vector<2x96xf32>
      %336 = vector.broadcast %79 : vector<1x96xf32> to vector<2x96xf32>
      %337 = arith.addf %335, %336 : vector<2x96xf32>
      %338 = vector.extract_strided_slice %arg9 {offsets = [0, 0], sizes = [1, 32], strides = [1, 1]} : vector<1x96xf32> to vector<1x32xf32>
      %339 = vector.extract_strided_slice %337 {offsets = [0, 0], sizes = [2, 32], strides = [1, 1]} : vector<2x96xf32> to vector<2x32xf32>
      %340 = vector.broadcast %338 : vector<1x32xf32> to vector<2x32xf32>
      %341 = arith.addf %340, %339 : vector<2x32xf32>
      %cst_123 = arith.constant 5.000000e-01 : f32
      %342 = vector.broadcast %cst_123 : f32 to vector<2x32xf32>
      %343 = arith.mulf %342, %341 : vector<2x32xf32>
      %344 = math.tanh %343 : vector<2x32xf32>
      %cst_124 = arith.constant 1.000000e+00 : f32
      %345 = vector.broadcast %cst_124 : f32 to vector<2x32xf32>
      %346 = arith.addf %344, %345 : vector<2x32xf32>
      %cst_125 = arith.constant 5.000000e-01 : f32
      %347 = vector.broadcast %cst_125 : f32 to vector<2x32xf32>
      %348 = arith.mulf %347, %346 : vector<2x32xf32>
      %349 = vector.extract_strided_slice %arg9 {offsets = [0, 32], sizes = [1, 32], strides = [1, 1]} : vector<1x96xf32> to vector<1x32xf32>
      %350 = vector.extract_strided_slice %337 {offsets = [0, 32], sizes = [2, 32], strides = [1, 1]} : vector<2x96xf32> to vector<2x32xf32>
      %351 = vector.broadcast %349 : vector<1x32xf32> to vector<2x32xf32>
      %352 = arith.addf %351, %350 : vector<2x32xf32>
      %cst_126 = arith.constant 5.000000e-01 : f32
      %353 = vector.broadcast %cst_126 : f32 to vector<2x32xf32>
      %354 = arith.mulf %353, %352 : vector<2x32xf32>
      %355 = math.tanh %354 : vector<2x32xf32>
      %cst_127 = arith.constant 1.000000e+00 : f32
      %356 = vector.broadcast %cst_127 : f32 to vector<2x32xf32>
      %357 = arith.addf %355, %356 : vector<2x32xf32>
      %cst_128 = arith.constant 5.000000e-01 : f32
      %358 = vector.broadcast %cst_128 : f32 to vector<2x32xf32>
      %359 = arith.mulf %358, %357 : vector<2x32xf32>
      %360 = vector.extract_strided_slice %arg9 {offsets = [0, 64], sizes = [1, 32], strides = [1, 1]} : vector<1x96xf32> to vector<1x32xf32>
      %361 = vector.extract_strided_slice %337 {offsets = [0, 64], sizes = [2, 32], strides = [1, 1]} : vector<2x96xf32> to vector<2x32xf32>
      %362 = arith.mulf %348, %361 : vector<2x32xf32>
      %363 = vector.broadcast %360 : vector<1x32xf32> to vector<2x32xf32>
      %364 = arith.addf %363, %362 : vector<2x32xf32>
      %365 = math.tanh %364 : vector<2x32xf32>
      %cst_129 = arith.constant 1.000000e+00 : f32
      %366 = vector.broadcast %cst_129 : f32 to vector<2x32xf32>
      %367 = arith.subf %366, %359 : vector<2x32xf32>
      %368 = arith.mulf %367, %365 : vector<2x32xf32>
      %369 = arith.mulf %359, %arg8 : vector<2x32xf32>
      %370 = arith.addf %368, %369 : vector<2x32xf32>
      %371 = arith.addf %arg9, %77 : vector<1x96xf32>
      scf.yield %370, %371 : vector<2x32xf32>, vector<1x96xf32>
    }
    %120 = vector.extract_strided_slice %73 {offsets = [2, 0], sizes = [2, 32], strides = [1, 1]} : vector<8x32xf32> to vector<2x32xf32>
    %cst_48 = arith.constant dense<0.000000e+00> : vector<2x32xf32>
    %121 = tpu.matmul %119#0, %66, %cst_48 {dimension_numbers = #tpu.dot_dimension_numbers<[1], [0], [0], [1], [0, 0, 1, 1], [], []>} : vector<2x32xf32>, vector<32x32xf32>, vector<2x32xf32> -> vector<2x32xf32>
    %122 = arith.addf %121, %120 : vector<2x32xf32>
    %cst_49 = arith.constant dense<0.000000e+00> : vector<2xf32>
    %123 = vector.multi_reduction <add>, %122, %cst_49 [1] : vector<2x32xf32> to vector<2xf32>
    %124 = vector.shape_cast %123 : vector<2xf32> to vector<2x1xf32>
    %cst_50 = arith.constant 3.200000e+01 : f32
    %125 = vector.broadcast %cst_50 : f32 to vector<2x1xf32>
    %126 = arith.divf %124, %125 : vector<2x1xf32>
    %127 = vector.broadcast %126 : vector<2x1xf32> to vector<2x32xf32>
    %128 = arith.subf %122, %127 : vector<2x32xf32>
    %129 = arith.mulf %128, %128 : vector<2x32xf32>
    %cst_51 = arith.constant dense<0.000000e+00> : vector<2xf32>
    %130 = vector.multi_reduction <add>, %129, %cst_51 [1] : vector<2x32xf32> to vector<2xf32>
    %131 = vector.shape_cast %130 : vector<2xf32> to vector<2x1xf32>
    %cst_52 = arith.constant 3.200000e+01 : f32
    %132 = vector.broadcast %cst_52 : f32 to vector<2x1xf32>
    %133 = arith.divf %131, %132 : vector<2x1xf32>
    %134 = vector.broadcast %126 : vector<2x1xf32> to vector<2x32xf32>
    %135 = arith.subf %122, %134 : vector<2x32xf32>
    %cst_53 = arith.constant 9.99999974E-6 : f32
    %136 = vector.broadcast %cst_53 : f32 to vector<2x1xf32>
    %137 = arith.addf %133, %136 : vector<2x1xf32>
    %138 = math.rsqrt %137 : vector<2x1xf32>
    %139 = vector.broadcast %138 : vector<2x1xf32> to vector<2x32xf32>
    %140 = arith.mulf %135, %139 : vector<2x32xf32>
    %141 = vector.broadcast %69 : vector<1x32xf32> to vector<2x32xf32>
    %142 = arith.mulf %140, %141 : vector<2x32xf32>
    %143 = vector.broadcast %70 : vector<1x32xf32> to vector<2x32xf32>
    %144 = arith.addf %142, %143 : vector<2x32xf32>
    %cst_54 = arith.constant 0.00999999977 : f32
    %145 = vector.broadcast %cst_54 : f32 to vector<2x32xf32>
    %146 = arith.mulf %145, %144 : vector<2x32xf32>
    %147 = arith.maximumf %144, %146 : vector<2x32xf32>
    %c2_55 = arith.constant 2 : index
    %148 = memref.load %arg0[%c2_55] : memref<6xi32, #tpu.memory_space<smem>>
    %149 = arith.addf %77, %78 : vector<1x96xf32>
    %c0_i32_56 = arith.constant 0 : i32
    %150 = arith.subi %148, %c0_i32_56 : i32
    %151 = arith.addi %c0_i32_56, %150 : i32
    %c1_i32_57 = arith.constant 1 : i32
    %152:2 = scf.for %arg7 = %c0_i32_56 to %151 step %c1_i32_57 iter_args(%arg8 = %147, %arg9 = %149) -> (vector<2x32xf32>, vector<1x96xf32>)  : i32 {
      %cst_122 = arith.constant dense<0.000000e+00> : vector<2x96xf32>
      %335 = tpu.matmul %arg8, %80, %cst_122 {dimension_numbers = #tpu.dot_dimension_numbers<[1], [0], [0], [1], [0, 0, 1, 1], [], []>} : vector<2x32xf32>, vector<32x96xf32>, vector<2x96xf32> -> vector<2x96xf32>
      %336 = vector.broadcast %79 : vector<1x96xf32> to vector<2x96xf32>
      %337 = arith.addf %335, %336 : vector<2x96xf32>
      %338 = vector.extract_strided_slice %arg9 {offsets = [0, 0], sizes = [1, 32], strides = [1, 1]} : vector<1x96xf32> to vector<1x32xf32>
      %339 = vector.extract_strided_slice %337 {offsets = [0, 0], sizes = [2, 32], strides = [1, 1]} : vector<2x96xf32> to vector<2x32xf32>
      %340 = vector.broadcast %338 : vector<1x32xf32> to vector<2x32xf32>
      %341 = arith.addf %340, %339 : vector<2x32xf32>
      %cst_123 = arith.constant 5.000000e-01 : f32
      %342 = vector.broadcast %cst_123 : f32 to vector<2x32xf32>
      %343 = arith.mulf %342, %341 : vector<2x32xf32>
      %344 = math.tanh %343 : vector<2x32xf32>
      %cst_124 = arith.constant 1.000000e+00 : f32
      %345 = vector.broadcast %cst_124 : f32 to vector<2x32xf32>
      %346 = arith.addf %344, %345 : vector<2x32xf32>
      %cst_125 = arith.constant 5.000000e-01 : f32
      %347 = vector.broadcast %cst_125 : f32 to vector<2x32xf32>
      %348 = arith.mulf %347, %346 : vector<2x32xf32>
      %349 = vector.extract_strided_slice %arg9 {offsets = [0, 32], sizes = [1, 32], strides = [1, 1]} : vector<1x96xf32> to vector<1x32xf32>
      %350 = vector.extract_strided_slice %337 {offsets = [0, 32], sizes = [2, 32], strides = [1, 1]} : vector<2x96xf32> to vector<2x32xf32>
      %351 = vector.broadcast %349 : vector<1x32xf32> to vector<2x32xf32>
      %352 = arith.addf %351, %350 : vector<2x32xf32>
      %cst_126 = arith.constant 5.000000e-01 : f32
      %353 = vector.broadcast %cst_126 : f32 to vector<2x32xf32>
      %354 = arith.mulf %353, %352 : vector<2x32xf32>
      %355 = math.tanh %354 : vector<2x32xf32>
      %cst_127 = arith.constant 1.000000e+00 : f32
      %356 = vector.broadcast %cst_127 : f32 to vector<2x32xf32>
      %357 = arith.addf %355, %356 : vector<2x32xf32>
      %cst_128 = arith.constant 5.000000e-01 : f32
      %358 = vector.broadcast %cst_128 : f32 to vector<2x32xf32>
      %359 = arith.mulf %358, %357 : vector<2x32xf32>
      %360 = vector.extract_strided_slice %arg9 {offsets = [0, 64], sizes = [1, 32], strides = [1, 1]} : vector<1x96xf32> to vector<1x32xf32>
      %361 = vector.extract_strided_slice %337 {offsets = [0, 64], sizes = [2, 32], strides = [1, 1]} : vector<2x96xf32> to vector<2x32xf32>
      %362 = arith.mulf %348, %361 : vector<2x32xf32>
      %363 = vector.broadcast %360 : vector<1x32xf32> to vector<2x32xf32>
      %364 = arith.addf %363, %362 : vector<2x32xf32>
      %365 = math.tanh %364 : vector<2x32xf32>
      %cst_129 = arith.constant 1.000000e+00 : f32
      %366 = vector.broadcast %cst_129 : f32 to vector<2x32xf32>
      %367 = arith.subf %366, %359 : vector<2x32xf32>
      %368 = arith.mulf %367, %365 : vector<2x32xf32>
      %369 = arith.mulf %359, %arg8 : vector<2x32xf32>
      %370 = arith.addf %368, %369 : vector<2x32xf32>
      %371 = arith.addf %arg9, %77 : vector<1x96xf32>
      scf.yield %370, %371 : vector<2x32xf32>, vector<1x96xf32>
    }
    %153 = vector.extract_strided_slice %73 {offsets = [4, 0], sizes = [2, 32], strides = [1, 1]} : vector<8x32xf32> to vector<2x32xf32>
    %cst_58 = arith.constant dense<0.000000e+00> : vector<2x32xf32>
    %154 = tpu.matmul %152#0, %66, %cst_58 {dimension_numbers = #tpu.dot_dimension_numbers<[1], [0], [0], [1], [0, 0, 1, 1], [], []>} : vector<2x32xf32>, vector<32x32xf32>, vector<2x32xf32> -> vector<2x32xf32>
    %155 = arith.addf %154, %153 : vector<2x32xf32>
    %cst_59 = arith.constant dense<0.000000e+00> : vector<2xf32>
    %156 = vector.multi_reduction <add>, %155, %cst_59 [1] : vector<2x32xf32> to vector<2xf32>
    %157 = vector.shape_cast %156 : vector<2xf32> to vector<2x1xf32>
    %cst_60 = arith.constant 3.200000e+01 : f32
    %158 = vector.broadcast %cst_60 : f32 to vector<2x1xf32>
    %159 = arith.divf %157, %158 : vector<2x1xf32>
    %160 = vector.broadcast %159 : vector<2x1xf32> to vector<2x32xf32>
    %161 = arith.subf %155, %160 : vector<2x32xf32>
    %162 = arith.mulf %161, %161 : vector<2x32xf32>
    %cst_61 = arith.constant dense<0.000000e+00> : vector<2xf32>
    %163 = vector.multi_reduction <add>, %162, %cst_61 [1] : vector<2x32xf32> to vector<2xf32>
    %164 = vector.shape_cast %163 : vector<2xf32> to vector<2x1xf32>
    %cst_62 = arith.constant 3.200000e+01 : f32
    %165 = vector.broadcast %cst_62 : f32 to vector<2x1xf32>
    %166 = arith.divf %164, %165 : vector<2x1xf32>
    %167 = vector.broadcast %159 : vector<2x1xf32> to vector<2x32xf32>
    %168 = arith.subf %155, %167 : vector<2x32xf32>
    %cst_63 = arith.constant 9.99999974E-6 : f32
    %169 = vector.broadcast %cst_63 : f32 to vector<2x1xf32>
    %170 = arith.addf %166, %169 : vector<2x1xf32>
    %171 = math.rsqrt %170 : vector<2x1xf32>
    %172 = vector.broadcast %171 : vector<2x1xf32> to vector<2x32xf32>
    %173 = arith.mulf %168, %172 : vector<2x32xf32>
    %174 = vector.broadcast %69 : vector<1x32xf32> to vector<2x32xf32>
    %175 = arith.mulf %173, %174 : vector<2x32xf32>
    %176 = vector.broadcast %70 : vector<1x32xf32> to vector<2x32xf32>
    %177 = arith.addf %175, %176 : vector<2x32xf32>
    %cst_64 = arith.constant 0.00999999977 : f32
    %178 = vector.broadcast %cst_64 : f32 to vector<2x32xf32>
    %179 = arith.mulf %178, %177 : vector<2x32xf32>
    %180 = arith.maximumf %177, %179 : vector<2x32xf32>
    %c3_65 = arith.constant 3 : index
    %181 = memref.load %arg0[%c3_65] : memref<6xi32, #tpu.memory_space<smem>>
    %182 = arith.addf %77, %78 : vector<1x96xf32>
    %c0_i32_66 = arith.constant 0 : i32
    %183 = arith.subi %181, %c0_i32_66 : i32
    %184 = arith.addi %c0_i32_66, %183 : i32
    %c1_i32_67 = arith.constant 1 : i32
    %185:2 = scf.for %arg7 = %c0_i32_66 to %184 step %c1_i32_67 iter_args(%arg8 = %180, %arg9 = %182) -> (vector<2x32xf32>, vector<1x96xf32>)  : i32 {
      %cst_122 = arith.constant dense<0.000000e+00> : vector<2x96xf32>
      %335 = tpu.matmul %arg8, %80, %cst_122 {dimension_numbers = #tpu.dot_dimension_numbers<[1], [0], [0], [1], [0, 0, 1, 1], [], []>} : vector<2x32xf32>, vector<32x96xf32>, vector<2x96xf32> -> vector<2x96xf32>
      %336 = vector.broadcast %79 : vector<1x96xf32> to vector<2x96xf32>
      %337 = arith.addf %335, %336 : vector<2x96xf32>
      %338 = vector.extract_strided_slice %arg9 {offsets = [0, 0], sizes = [1, 32], strides = [1, 1]} : vector<1x96xf32> to vector<1x32xf32>
      %339 = vector.extract_strided_slice %337 {offsets = [0, 0], sizes = [2, 32], strides = [1, 1]} : vector<2x96xf32> to vector<2x32xf32>
      %340 = vector.broadcast %338 : vector<1x32xf32> to vector<2x32xf32>
      %341 = arith.addf %340, %339 : vector<2x32xf32>
      %cst_123 = arith.constant 5.000000e-01 : f32
      %342 = vector.broadcast %cst_123 : f32 to vector<2x32xf32>
      %343 = arith.mulf %342, %341 : vector<2x32xf32>
      %344 = math.tanh %343 : vector<2x32xf32>
      %cst_124 = arith.constant 1.000000e+00 : f32
      %345 = vector.broadcast %cst_124 : f32 to vector<2x32xf32>
      %346 = arith.addf %344, %345 : vector<2x32xf32>
      %cst_125 = arith.constant 5.000000e-01 : f32
      %347 = vector.broadcast %cst_125 : f32 to vector<2x32xf32>
      %348 = arith.mulf %347, %346 : vector<2x32xf32>
      %349 = vector.extract_strided_slice %arg9 {offsets = [0, 32], sizes = [1, 32], strides = [1, 1]} : vector<1x96xf32> to vector<1x32xf32>
      %350 = vector.extract_strided_slice %337 {offsets = [0, 32], sizes = [2, 32], strides = [1, 1]} : vector<2x96xf32> to vector<2x32xf32>
      %351 = vector.broadcast %349 : vector<1x32xf32> to vector<2x32xf32>
      %352 = arith.addf %351, %350 : vector<2x32xf32>
      %cst_126 = arith.constant 5.000000e-01 : f32
      %353 = vector.broadcast %cst_126 : f32 to vector<2x32xf32>
      %354 = arith.mulf %353, %352 : vector<2x32xf32>
      %355 = math.tanh %354 : vector<2x32xf32>
      %cst_127 = arith.constant 1.000000e+00 : f32
      %356 = vector.broadcast %cst_127 : f32 to vector<2x32xf32>
      %357 = arith.addf %355, %356 : vector<2x32xf32>
      %cst_128 = arith.constant 5.000000e-01 : f32
      %358 = vector.broadcast %cst_128 : f32 to vector<2x32xf32>
      %359 = arith.mulf %358, %357 : vector<2x32xf32>
      %360 = vector.extract_strided_slice %arg9 {offsets = [0, 64], sizes = [1, 32], strides = [1, 1]} : vector<1x96xf32> to vector<1x32xf32>
      %361 = vector.extract_strided_slice %337 {offsets = [0, 64], sizes = [2, 32], strides = [1, 1]} : vector<2x96xf32> to vector<2x32xf32>
      %362 = arith.mulf %348, %361 : vector<2x32xf32>
      %363 = vector.broadcast %360 : vector<1x32xf32> to vector<2x32xf32>
      %364 = arith.addf %363, %362 : vector<2x32xf32>
      %365 = math.tanh %364 : vector<2x32xf32>
      %cst_129 = arith.constant 1.000000e+00 : f32
      %366 = vector.broadcast %cst_129 : f32 to vector<2x32xf32>
      %367 = arith.subf %366, %359 : vector<2x32xf32>
      %368 = arith.mulf %367, %365 : vector<2x32xf32>
      %369 = arith.mulf %359, %arg8 : vector<2x32xf32>
      %370 = arith.addf %368, %369 : vector<2x32xf32>
      %371 = arith.addf %arg9, %77 : vector<1x96xf32>
      scf.yield %370, %371 : vector<2x32xf32>, vector<1x96xf32>
    }
    %186 = vector.extract_strided_slice %73 {offsets = [6, 0], sizes = [2, 32], strides = [1, 1]} : vector<8x32xf32> to vector<2x32xf32>
    %cst_68 = arith.constant dense<0.000000e+00> : vector<2x32xf32>
    %187 = tpu.matmul %185#0, %66, %cst_68 {dimension_numbers = #tpu.dot_dimension_numbers<[1], [0], [0], [1], [0, 0, 1, 1], [], []>} : vector<2x32xf32>, vector<32x32xf32>, vector<2x32xf32> -> vector<2x32xf32>
    %188 = arith.addf %187, %186 : vector<2x32xf32>
    %cst_69 = arith.constant dense<0.000000e+00> : vector<2xf32>
    %189 = vector.multi_reduction <add>, %188, %cst_69 [1] : vector<2x32xf32> to vector<2xf32>
    %190 = vector.shape_cast %189 : vector<2xf32> to vector<2x1xf32>
    %cst_70 = arith.constant 3.200000e+01 : f32
    %191 = vector.broadcast %cst_70 : f32 to vector<2x1xf32>
    %192 = arith.divf %190, %191 : vector<2x1xf32>
    %193 = vector.broadcast %192 : vector<2x1xf32> to vector<2x32xf32>
    %194 = arith.subf %188, %193 : vector<2x32xf32>
    %195 = arith.mulf %194, %194 : vector<2x32xf32>
    %cst_71 = arith.constant dense<0.000000e+00> : vector<2xf32>
    %196 = vector.multi_reduction <add>, %195, %cst_71 [1] : vector<2x32xf32> to vector<2xf32>
    %197 = vector.shape_cast %196 : vector<2xf32> to vector<2x1xf32>
    %cst_72 = arith.constant 3.200000e+01 : f32
    %198 = vector.broadcast %cst_72 : f32 to vector<2x1xf32>
    %199 = arith.divf %197, %198 : vector<2x1xf32>
    %200 = vector.broadcast %192 : vector<2x1xf32> to vector<2x32xf32>
    %201 = arith.subf %188, %200 : vector<2x32xf32>
    %cst_73 = arith.constant 9.99999974E-6 : f32
    %202 = vector.broadcast %cst_73 : f32 to vector<2x1xf32>
    %203 = arith.addf %199, %202 : vector<2x1xf32>
    %204 = math.rsqrt %203 : vector<2x1xf32>
    %205 = vector.broadcast %204 : vector<2x1xf32> to vector<2x32xf32>
    %206 = arith.mulf %201, %205 : vector<2x32xf32>
    %207 = vector.broadcast %69 : vector<1x32xf32> to vector<2x32xf32>
    %208 = arith.mulf %206, %207 : vector<2x32xf32>
    %209 = vector.broadcast %70 : vector<1x32xf32> to vector<2x32xf32>
    %210 = arith.addf %208, %209 : vector<2x32xf32>
    %cst_74 = arith.constant 0.00999999977 : f32
    %211 = vector.broadcast %cst_74 : f32 to vector<2x32xf32>
    %212 = arith.mulf %211, %210 : vector<2x32xf32>
    %213 = arith.maximumf %210, %212 : vector<2x32xf32>
    %c4_75 = arith.constant 4 : index
    %214 = memref.load %arg0[%c4_75] : memref<6xi32, #tpu.memory_space<smem>>
    %215 = arith.addf %77, %78 : vector<1x96xf32>
    %c0_i32_76 = arith.constant 0 : i32
    %216 = arith.subi %214, %c0_i32_76 : i32
    %217 = arith.addi %c0_i32_76, %216 : i32
    %c1_i32_77 = arith.constant 1 : i32
    %218:2 = scf.for %arg7 = %c0_i32_76 to %217 step %c1_i32_77 iter_args(%arg8 = %213, %arg9 = %215) -> (vector<2x32xf32>, vector<1x96xf32>)  : i32 {
      %cst_122 = arith.constant dense<0.000000e+00> : vector<2x96xf32>
      %335 = tpu.matmul %arg8, %80, %cst_122 {dimension_numbers = #tpu.dot_dimension_numbers<[1], [0], [0], [1], [0, 0, 1, 1], [], []>} : vector<2x32xf32>, vector<32x96xf32>, vector<2x96xf32> -> vector<2x96xf32>
      %336 = vector.broadcast %79 : vector<1x96xf32> to vector<2x96xf32>
      %337 = arith.addf %335, %336 : vector<2x96xf32>
      %338 = vector.extract_strided_slice %arg9 {offsets = [0, 0], sizes = [1, 32], strides = [1, 1]} : vector<1x96xf32> to vector<1x32xf32>
      %339 = vector.extract_strided_slice %337 {offsets = [0, 0], sizes = [2, 32], strides = [1, 1]} : vector<2x96xf32> to vector<2x32xf32>
      %340 = vector.broadcast %338 : vector<1x32xf32> to vector<2x32xf32>
      %341 = arith.addf %340, %339 : vector<2x32xf32>
      %cst_123 = arith.constant 5.000000e-01 : f32
      %342 = vector.broadcast %cst_123 : f32 to vector<2x32xf32>
      %343 = arith.mulf %342, %341 : vector<2x32xf32>
      %344 = math.tanh %343 : vector<2x32xf32>
      %cst_124 = arith.constant 1.000000e+00 : f32
      %345 = vector.broadcast %cst_124 : f32 to vector<2x32xf32>
      %346 = arith.addf %344, %345 : vector<2x32xf32>
      %cst_125 = arith.constant 5.000000e-01 : f32
      %347 = vector.broadcast %cst_125 : f32 to vector<2x32xf32>
      %348 = arith.mulf %347, %346 : vector<2x32xf32>
      %349 = vector.extract_strided_slice %arg9 {offsets = [0, 32], sizes = [1, 32], strides = [1, 1]} : vector<1x96xf32> to vector<1x32xf32>
      %350 = vector.extract_strided_slice %337 {offsets = [0, 32], sizes = [2, 32], strides = [1, 1]} : vector<2x96xf32> to vector<2x32xf32>
      %351 = vector.broadcast %349 : vector<1x32xf32> to vector<2x32xf32>
      %352 = arith.addf %351, %350 : vector<2x32xf32>
      %cst_126 = arith.constant 5.000000e-01 : f32
      %353 = vector.broadcast %cst_126 : f32 to vector<2x32xf32>
      %354 = arith.mulf %353, %352 : vector<2x32xf32>
      %355 = math.tanh %354 : vector<2x32xf32>
      %cst_127 = arith.constant 1.000000e+00 : f32
      %356 = vector.broadcast %cst_127 : f32 to vector<2x32xf32>
      %357 = arith.addf %355, %356 : vector<2x32xf32>
      %cst_128 = arith.constant 5.000000e-01 : f32
      %358 = vector.broadcast %cst_128 : f32 to vector<2x32xf32>
      %359 = arith.mulf %358, %357 : vector<2x32xf32>
      %360 = vector.extract_strided_slice %arg9 {offsets = [0, 64], sizes = [1, 32], strides = [1, 1]} : vector<1x96xf32> to vector<1x32xf32>
      %361 = vector.extract_strided_slice %337 {offsets = [0, 64], sizes = [2, 32], strides = [1, 1]} : vector<2x96xf32> to vector<2x32xf32>
      %362 = arith.mulf %348, %361 : vector<2x32xf32>
      %363 = vector.broadcast %360 : vector<1x32xf32> to vector<2x32xf32>
      %364 = arith.addf %363, %362 : vector<2x32xf32>
      %365 = math.tanh %364 : vector<2x32xf32>
      %cst_129 = arith.constant 1.000000e+00 : f32
      %366 = vector.broadcast %cst_129 : f32 to vector<2x32xf32>
      %367 = arith.subf %366, %359 : vector<2x32xf32>
      %368 = arith.mulf %367, %365 : vector<2x32xf32>
      %369 = arith.mulf %359, %arg8 : vector<2x32xf32>
      %370 = arith.addf %368, %369 : vector<2x32xf32>
      %371 = arith.addf %arg9, %77 : vector<1x96xf32>
      scf.yield %370, %371 : vector<2x32xf32>, vector<1x96xf32>
    }
    %219 = vector.extract_strided_slice %76 {offsets = [0, 0], sizes = [2, 32], strides = [1, 1]} : vector<4x32xf32> to vector<2x32xf32>
    %cst_78 = arith.constant dense<0.000000e+00> : vector<2x32xf32>
    %220 = tpu.matmul %218#0, %66, %cst_78 {dimension_numbers = #tpu.dot_dimension_numbers<[1], [0], [0], [1], [0, 0, 1, 1], [], []>} : vector<2x32xf32>, vector<32x32xf32>, vector<2x32xf32> -> vector<2x32xf32>
    %221 = arith.addf %220, %219 : vector<2x32xf32>
    %cst_79 = arith.constant dense<0.000000e+00> : vector<2xf32>
    %222 = vector.multi_reduction <add>, %221, %cst_79 [1] : vector<2x32xf32> to vector<2xf32>
    %223 = vector.shape_cast %222 : vector<2xf32> to vector<2x1xf32>
    %cst_80 = arith.constant 3.200000e+01 : f32
    %224 = vector.broadcast %cst_80 : f32 to vector<2x1xf32>
    %225 = arith.divf %223, %224 : vector<2x1xf32>
    %226 = vector.broadcast %225 : vector<2x1xf32> to vector<2x32xf32>
    %227 = arith.subf %221, %226 : vector<2x32xf32>
    %228 = arith.mulf %227, %227 : vector<2x32xf32>
    %cst_81 = arith.constant dense<0.000000e+00> : vector<2xf32>
    %229 = vector.multi_reduction <add>, %228, %cst_81 [1] : vector<2x32xf32> to vector<2xf32>
    %230 = vector.shape_cast %229 : vector<2xf32> to vector<2x1xf32>
    %cst_82 = arith.constant 3.200000e+01 : f32
    %231 = vector.broadcast %cst_82 : f32 to vector<2x1xf32>
    %232 = arith.divf %230, %231 : vector<2x1xf32>
    %233 = vector.broadcast %225 : vector<2x1xf32> to vector<2x32xf32>
    %234 = arith.subf %221, %233 : vector<2x32xf32>
    %cst_83 = arith.constant 9.99999974E-6 : f32
    %235 = vector.broadcast %cst_83 : f32 to vector<2x1xf32>
    %236 = arith.addf %232, %235 : vector<2x1xf32>
    %237 = math.rsqrt %236 : vector<2x1xf32>
    %238 = vector.broadcast %237 : vector<2x1xf32> to vector<2x32xf32>
    %239 = arith.mulf %234, %238 : vector<2x32xf32>
    %240 = vector.broadcast %69 : vector<1x32xf32> to vector<2x32xf32>
    %241 = arith.mulf %239, %240 : vector<2x32xf32>
    %242 = vector.broadcast %70 : vector<1x32xf32> to vector<2x32xf32>
    %243 = arith.addf %241, %242 : vector<2x32xf32>
    %cst_84 = arith.constant 0.00999999977 : f32
    %244 = vector.broadcast %cst_84 : f32 to vector<2x32xf32>
    %245 = arith.mulf %244, %243 : vector<2x32xf32>
    %246 = arith.maximumf %243, %245 : vector<2x32xf32>
    %c5_85 = arith.constant 5 : index
    %247 = memref.load %arg0[%c5_85] : memref<6xi32, #tpu.memory_space<smem>>
    %248 = arith.addf %77, %78 : vector<1x96xf32>
    %c0_i32_86 = arith.constant 0 : i32
    %249 = arith.subi %247, %c0_i32_86 : i32
    %250 = arith.addi %c0_i32_86, %249 : i32
    %c1_i32_87 = arith.constant 1 : i32
    %251:2 = scf.for %arg7 = %c0_i32_86 to %250 step %c1_i32_87 iter_args(%arg8 = %246, %arg9 = %248) -> (vector<2x32xf32>, vector<1x96xf32>)  : i32 {
      %cst_122 = arith.constant dense<0.000000e+00> : vector<2x96xf32>
      %335 = tpu.matmul %arg8, %80, %cst_122 {dimension_numbers = #tpu.dot_dimension_numbers<[1], [0], [0], [1], [0, 0, 1, 1], [], []>} : vector<2x32xf32>, vector<32x96xf32>, vector<2x96xf32> -> vector<2x96xf32>
      %336 = vector.broadcast %79 : vector<1x96xf32> to vector<2x96xf32>
      %337 = arith.addf %335, %336 : vector<2x96xf32>
      %338 = vector.extract_strided_slice %arg9 {offsets = [0, 0], sizes = [1, 32], strides = [1, 1]} : vector<1x96xf32> to vector<1x32xf32>
      %339 = vector.extract_strided_slice %337 {offsets = [0, 0], sizes = [2, 32], strides = [1, 1]} : vector<2x96xf32> to vector<2x32xf32>
      %340 = vector.broadcast %338 : vector<1x32xf32> to vector<2x32xf32>
      %341 = arith.addf %340, %339 : vector<2x32xf32>
      %cst_123 = arith.constant 5.000000e-01 : f32
      %342 = vector.broadcast %cst_123 : f32 to vector<2x32xf32>
      %343 = arith.mulf %342, %341 : vector<2x32xf32>
      %344 = math.tanh %343 : vector<2x32xf32>
      %cst_124 = arith.constant 1.000000e+00 : f32
      %345 = vector.broadcast %cst_124 : f32 to vector<2x32xf32>
      %346 = arith.addf %344, %345 : vector<2x32xf32>
      %cst_125 = arith.constant 5.000000e-01 : f32
      %347 = vector.broadcast %cst_125 : f32 to vector<2x32xf32>
      %348 = arith.mulf %347, %346 : vector<2x32xf32>
      %349 = vector.extract_strided_slice %arg9 {offsets = [0, 32], sizes = [1, 32], strides = [1, 1]} : vector<1x96xf32> to vector<1x32xf32>
      %350 = vector.extract_strided_slice %337 {offsets = [0, 32], sizes = [2, 32], strides = [1, 1]} : vector<2x96xf32> to vector<2x32xf32>
      %351 = vector.broadcast %349 : vector<1x32xf32> to vector<2x32xf32>
      %352 = arith.addf %351, %350 : vector<2x32xf32>
      %cst_126 = arith.constant 5.000000e-01 : f32
      %353 = vector.broadcast %cst_126 : f32 to vector<2x32xf32>
      %354 = arith.mulf %353, %352 : vector<2x32xf32>
      %355 = math.tanh %354 : vector<2x32xf32>
      %cst_127 = arith.constant 1.000000e+00 : f32
      %356 = vector.broadcast %cst_127 : f32 to vector<2x32xf32>
      %357 = arith.addf %355, %356 : vector<2x32xf32>
      %cst_128 = arith.constant 5.000000e-01 : f32
      %358 = vector.broadcast %cst_128 : f32 to vector<2x32xf32>
      %359 = arith.mulf %358, %357 : vector<2x32xf32>
      %360 = vector.extract_strided_slice %arg9 {offsets = [0, 64], sizes = [1, 32], strides = [1, 1]} : vector<1x96xf32> to vector<1x32xf32>
      %361 = vector.extract_strided_slice %337 {offsets = [0, 64], sizes = [2, 32], strides = [1, 1]} : vector<2x96xf32> to vector<2x32xf32>
      %362 = arith.mulf %348, %361 : vector<2x32xf32>
      %363 = vector.broadcast %360 : vector<1x32xf32> to vector<2x32xf32>
      %364 = arith.addf %363, %362 : vector<2x32xf32>
      %365 = math.tanh %364 : vector<2x32xf32>
      %cst_129 = arith.constant 1.000000e+00 : f32
      %366 = vector.broadcast %cst_129 : f32 to vector<2x32xf32>
      %367 = arith.subf %366, %359 : vector<2x32xf32>
      %368 = arith.mulf %367, %365 : vector<2x32xf32>
      %369 = arith.mulf %359, %arg8 : vector<2x32xf32>
      %370 = arith.addf %368, %369 : vector<2x32xf32>
      %371 = arith.addf %arg9, %77 : vector<1x96xf32>
      scf.yield %370, %371 : vector<2x32xf32>, vector<1x96xf32>
    }
    %252 = vector.extract_strided_slice %76 {offsets = [2, 0], sizes = [2, 32], strides = [1, 1]} : vector<4x32xf32> to vector<2x32xf32>
    %cst_88 = arith.constant dense<0.000000e+00> : vector<2x32xf32>
    %253 = tpu.matmul %251#0, %66, %cst_88 {dimension_numbers = #tpu.dot_dimension_numbers<[1], [0], [0], [1], [0, 0, 1, 1], [], []>} : vector<2x32xf32>, vector<32x32xf32>, vector<2x32xf32> -> vector<2x32xf32>
    %254 = arith.addf %253, %252 : vector<2x32xf32>
    %cst_89 = arith.constant dense<0.000000e+00> : vector<2xf32>
    %255 = vector.multi_reduction <add>, %254, %cst_89 [1] : vector<2x32xf32> to vector<2xf32>
    %256 = vector.shape_cast %255 : vector<2xf32> to vector<2x1xf32>
    %cst_90 = arith.constant 3.200000e+01 : f32
    %257 = vector.broadcast %cst_90 : f32 to vector<2x1xf32>
    %258 = arith.divf %256, %257 : vector<2x1xf32>
    %259 = vector.broadcast %258 : vector<2x1xf32> to vector<2x32xf32>
    %260 = arith.subf %254, %259 : vector<2x32xf32>
    %261 = arith.mulf %260, %260 : vector<2x32xf32>
    %cst_91 = arith.constant dense<0.000000e+00> : vector<2xf32>
    %262 = vector.multi_reduction <add>, %261, %cst_91 [1] : vector<2x32xf32> to vector<2xf32>
    %263 = vector.shape_cast %262 : vector<2xf32> to vector<2x1xf32>
    %cst_92 = arith.constant 3.200000e+01 : f32
    %264 = vector.broadcast %cst_92 : f32 to vector<2x1xf32>
    %265 = arith.divf %263, %264 : vector<2x1xf32>
    %266 = vector.broadcast %258 : vector<2x1xf32> to vector<2x32xf32>
    %267 = arith.subf %254, %266 : vector<2x32xf32>
    %cst_93 = arith.constant 9.99999974E-6 : f32
    %268 = vector.broadcast %cst_93 : f32 to vector<2x1xf32>
    %269 = arith.addf %265, %268 : vector<2x1xf32>
    %270 = math.rsqrt %269 : vector<2x1xf32>
    %271 = vector.broadcast %270 : vector<2x1xf32> to vector<2x32xf32>
    %272 = arith.mulf %267, %271 : vector<2x32xf32>
    %273 = vector.broadcast %69 : vector<1x32xf32> to vector<2x32xf32>
    %274 = arith.mulf %272, %273 : vector<2x32xf32>
    %275 = vector.broadcast %70 : vector<1x32xf32> to vector<2x32xf32>
    %276 = arith.addf %274, %275 : vector<2x32xf32>
    %cst_94 = arith.constant 0.00999999977 : f32
    %277 = vector.broadcast %cst_94 : f32 to vector<2x32xf32>
    %278 = arith.mulf %277, %276 : vector<2x32xf32>
    %279 = arith.maximumf %276, %278 : vector<2x32xf32>
    %c0_95 = arith.constant 0 : index
    %c0_96 = arith.constant 0 : index
    %280 = vector.load %arg6[%c0_95, %c0_96] : memref<2x32xf32, #tpu.memory_space<vmem>>, vector<2x32xf32>
    tpu.vector_store %arg6[%c0_95, %c0_96], %279 {strides = array<i32>} : memref<2x32xf32, #tpu.memory_space<vmem>>, vector<2x32xf32>,
    %281 = tpu.concatenate %218#0, %251#0 in 0 : vector<2x32xf32>, vector<2x32xf32> -> vector<4x32xf32>
    %282 = tpu.concatenate %246, %279 in 0 : vector<2x32xf32>, vector<2x32xf32> -> vector<4x32xf32>
    %283 = tpu.concatenate %281, %282 in 1 : vector<4x32xf32>, vector<4x32xf32> -> vector<4x64xf32>
    %c12 = arith.constant 12 : index
    %c0_97 = arith.constant 0 : index
    %284 = vector.load %arg3[%c12, %c0_97] : memref<123x128xf32, #tpu.memory_space<vmem>>, vector<1x128xf32>
    %c13 = arith.constant 13 : index
    %c0_98 = arith.constant 0 : index
    %285 = vector.load %arg3[%c13, %c0_98] : memref<123x128xf32, #tpu.memory_space<vmem>>, vector<1x128xf32>
    %c14 = arith.constant 14 : index
    %c0_99 = arith.constant 0 : index
    %286 = vector.load %arg3[%c14, %c0_99] : memref<123x128xf32, #tpu.memory_space<vmem>>, vector<1x128xf32>
    %c15 = arith.constant 15 : index
    %c0_100 = arith.constant 0 : index
    %287 = vector.load %arg3[%c15, %c0_100] : memref<123x128xf32, #tpu.memory_space<vmem>>, vector<1x128xf32>
    %c16 = arith.constant 16 : index
    %c0_101 = arith.constant 0 : index
    %288 = vector.load %arg3[%c16, %c0_101] : memref<123x128xf32, #tpu.memory_space<vmem>>, vector<1x128xf32>
    %c17 = arith.constant 17 : index
    %c0_102 = arith.constant 0 : index
    %289 = vector.load %arg3[%c17, %c0_102] : memref<123x128xf32, #tpu.memory_space<vmem>>, vector<1x128xf32>
    %c18 = arith.constant 18 : index
    %c0_103 = arith.constant 0 : index
    %290 = vector.load %arg3[%c18, %c0_103] : memref<123x128xf32, #tpu.memory_space<vmem>>, vector<1x16xf32>
    %c192 = arith.constant 192 : index
    %c0_104 = arith.constant 0 : index
    %291 = vector.load %arg4[%c192, %c0_104] : memref<448x128xf32, #tpu.memory_space<vmem>>, vector<128x128xf32>
    %c0_105 = arith.constant 0 : index
    %c0_106 = arith.constant 0 : index
    %292 = vector.load %arg4[%c0_105, %c0_106] : memref<448x128xf32, #tpu.memory_space<vmem>>, vector<64x128xf32>
    %cst_107 = arith.constant dense<0.000000e+00> : vector<4x128xf32>
    %293 = tpu.matmul %283, %292, %cst_107 {dimension_numbers = #tpu.dot_dimension_numbers<[1], [0], [0], [1], [0, 0, 1, 1], [], []>} : vector<4x64xf32>, vector<64x128xf32>, vector<4x128xf32> -> vector<4x128xf32>
    %294 = vector.broadcast %284 : vector<1x128xf32> to vector<4x128xf32>
    %295 = arith.addf %293, %294 : vector<4x128xf32>
    %cst_108 = arith.constant dense<0.000000e+00> : vector<4x128xf32>
    %296 = tpu.matmul %295, %291, %cst_108 {dimension_numbers = #tpu.dot_dimension_numbers<[1], [0], [0], [1], [0, 0, 1, 1], [], []>} : vector<4x128xf32>, vector<128x128xf32>, vector<4x128xf32> -> vector<4x128xf32>
    %297 = arith.subf %295, %296 : vector<4x128xf32>
    %298 = arith.mulf %297, %297 : vector<4x128xf32>
    %cst_109 = arith.constant dense<0.000000e+00> : vector<4x128xf32>
    %299 = tpu.matmul %298, %291, %cst_109 {dimension_numbers = #tpu.dot_dimension_numbers<[1], [0], [0], [1], [0, 0, 1, 1], [], []>} : vector<4x128xf32>, vector<128x128xf32>, vector<4x128xf32> -> vector<4x128xf32>
    %cst_110 = arith.constant 9.99999974E-6 : f32
    %300 = vector.broadcast %cst_110 : f32 to vector<4x128xf32>
    %301 = arith.addf %299, %300 : vector<4x128xf32>
    %302 = math.rsqrt %301 : vector<4x128xf32>
    %303 = arith.mulf %297, %302 : vector<4x128xf32>
    %304 = vector.broadcast %285 : vector<1x128xf32> to vector<4x128xf32>
    %305 = arith.mulf %303, %304 : vector<4x128xf32>
    %306 = vector.broadcast %286 : vector<1x128xf32> to vector<4x128xf32>
    %307 = arith.addf %305, %306 : vector<4x128xf32>
    %cst_111 = arith.constant 0.00999999977 : f32
    %308 = vector.broadcast %cst_111 : f32 to vector<4x128xf32>
    %309 = arith.mulf %308, %307 : vector<4x128xf32>
    %310 = arith.maximumf %307, %309 : vector<4x128xf32>
    %c64 = arith.constant 64 : index
    %c0_112 = arith.constant 0 : index
    %311 = vector.load %arg4[%c64, %c0_112] : memref<448x128xf32, #tpu.memory_space<vmem>>, vector<128x128xf32>
    %cst_113 = arith.constant dense<0.000000e+00> : vector<4x128xf32>
    %312 = tpu.matmul %310, %311, %cst_113 {dimension_numbers = #tpu.dot_dimension_numbers<[1], [0], [0], [1], [0, 0, 1, 1], [], []>} : vector<4x128xf32>, vector<128x128xf32>, vector<4x128xf32> -> vector<4x128xf32>
    %313 = vector.broadcast %287 : vector<1x128xf32> to vector<4x128xf32>
    %314 = arith.addf %312, %313 : vector<4x128xf32>
    %cst_114 = arith.constant dense<0.000000e+00> : vector<4x128xf32>
    %315 = tpu.matmul %314, %291, %cst_114 {dimension_numbers = #tpu.dot_dimension_numbers<[1], [0], [0], [1], [0, 0, 1, 1], [], []>} : vector<4x128xf32>, vector<128x128xf32>, vector<4x128xf32> -> vector<4x128xf32>
    %316 = arith.subf %314, %315 : vector<4x128xf32>
    %317 = arith.mulf %316, %316 : vector<4x128xf32>
    %cst_115 = arith.constant dense<0.000000e+00> : vector<4x128xf32>
    %318 = tpu.matmul %317, %291, %cst_115 {dimension_numbers = #tpu.dot_dimension_numbers<[1], [0], [0], [1], [0, 0, 1, 1], [], []>} : vector<4x128xf32>, vector<128x128xf32>, vector<4x128xf32> -> vector<4x128xf32>
    %cst_116 = arith.constant 9.99999974E-6 : f32
    %319 = vector.broadcast %cst_116 : f32 to vector<4x128xf32>
    %320 = arith.addf %318, %319 : vector<4x128xf32>
    %321 = math.rsqrt %320 : vector<4x128xf32>
    %322 = arith.mulf %316, %321 : vector<4x128xf32>
    %323 = vector.broadcast %288 : vector<1x128xf32> to vector<4x128xf32>
    %324 = arith.mulf %322, %323 : vector<4x128xf32>
    %325 = vector.broadcast %289 : vector<1x128xf32> to vector<4x128xf32>
    %326 = arith.addf %324, %325 : vector<4x128xf32>
    %cst_117 = arith.constant 0.00999999977 : f32
    %327 = vector.broadcast %cst_117 : f32 to vector<4x128xf32>
    %328 = arith.mulf %327, %326 : vector<4x128xf32>
    %329 = arith.maximumf %326, %328 : vector<4x128xf32>
    %c320 = arith.constant 320 : index
    %c0_118 = arith.constant 0 : index
    %330 = vector.load %arg4[%c320, %c0_118] : memref<448x128xf32, #tpu.memory_space<vmem>>, vector<128x16xf32>
    %cst_119 = arith.constant dense<0.000000e+00> : vector<4x16xf32>
    %331 = tpu.matmul %329, %330, %cst_119 {dimension_numbers = #tpu.dot_dimension_numbers<[1], [0], [0], [1], [0, 0, 1, 1], [], []>} : vector<4x128xf32>, vector<128x16xf32>, vector<4x16xf32> -> vector<4x16xf32>
    %332 = vector.broadcast %290 : vector<1x16xf32> to vector<4x16xf32>
    %333 = arith.addf %331, %332 : vector<4x16xf32>
    %c0_120 = arith.constant 0 : index
    %c0_121 = arith.constant 0 : index
    %334 = vector.load %arg5[%c0_120, %c0_121] : memref<4x16xf32, #tpu.memory_space<vmem>>, vector<4x16xf32>
    tpu.vector_store %arg5[%c0_120, %c0_121], %333 {strides = array<i32>} : memref<4x16xf32, #tpu.memory_space<vmem>>, vector<4x16xf32>,
    return
  }
}

</mosaic_0001>

<bundles_post_ra>
// kernel: tpu_custom_call.1
= control target key start
LH: loop header
LB: loop body
LE: loop exit
PB: predicated region body
PF: predicated region fallthrough
CT: control target
= control target key end

     0   :  { %12 = vsyncpa [#allocation5], 0  ;;  %s2315_s0 = inlined_call_operand.vmem [shape: s32[6], index: 0, kind: input, shape index: {}]   ;;  %s2316_s1 = inlined_call_operand.vmem [shape: f32[8,4], index: 1, kind: input, shape index: {}]   ;;  %s2317_s2 = inlined_call_operand.vmem [shape: f32[4,4], index: 2, kind: input, shape index: {}]   ;;  %s2318_s3 = inlined_call_operand.hbm [shape: f32[123,128], index: 3, kind: input, shape index: {}]   ;;  %s2319_s4 = inlined_call_operand.hbm [shape: f32[448,128], index: 4, kind: input, shape index: {}]   ;;  %s2320_s5 = inlined_call_operand.hbm [shape: f32[4,16], index: 5, kind: output, shape index: {0}]   ;;  %s2321_s6 = inlined_call_operand.hbm [shape: f32[2,32], index: 6, kind: output, shape index: {1}]  }
   0x1   :  { %13 = vsyncpa [#allocation3], 0 }
   0x2   :  { %14 = vsyncpa [#allocation8], 0 }
   0x3   :  { %15 = vsyncpa [#allocation4], 0 }
   0x4   :  { %16 = vsyncpa [#allocation11], 0  ;;  %s22_s23 = sshll.u32 %s2315_s0, 4  ;;  %s34_s26 = sshll.u32 %s2318_s3, 4  ;;  %s23_s23 = int_to_ptr.vmem [resolvable:$true] %s22_s23  ;;  %s35_s26 = int_to_ptr.hbm [resolvable:$true] %s34_s26 }
   0x5   :  { %s1950_s27 = smov [#allocation2]   ;;  %s1951_s28 = smov [#allocation6]  }
   0x6   :  { %25 = dma.vmem_to_smem %s23_s23, 16, %s1950_s27, [#allocation5]  }
   0x7   :  { %s36_s29 = sshll.u32 %s1951_s28, 4  ;;  %s1952_s30 = smov 128   ;;  %s37_s29 = int_to_ptr.vmem [resolvable:$true] %s36_s29 }
   0x8   :  { %s1953_s7 = smov 8   ;;  %s47_s10 = sshll.u32 %s2319_s4, 4  ;;  %s48_s10 = int_to_ptr.hbm [resolvable:$true] %s47_s10 }
   0x9   :  { %42 = dma.hbm_to_vmem [thread:$0]  %s35_s26, 2048, %s37_s29, [#allocation3], %s1952_s30, %s1952_s30, %s1953_s7  }
   0xa   :  { %s1954_s0 = smov [#allocation7]  }
   0xb   :  { %s49_s11 = sshll.u32 %s1954_s0, 4  ;;  %s50_s11 = int_to_ptr.vmem [resolvable:$true] %s49_s11 }
   0xc   :  { %55 = dma.hbm_to_vmem [thread:$0]  %s48_s10, 7168, %s50_s11, [#allocation8], %s1952_s30, %s1952_s30, %s1953_s7  }
   0xd   :  { %1844 = dma.done.wait [#allocation5], 16  }
   0xe   :  { %1845 = vsyncadd [#allocation5], 4294967280 }
   0xf   :  { %1846 = dma.done.wait [#allocation3], 2048  }
  0x10   :  { %1847 = vsyncadd [#allocation3], 4294965248 }
  0x11   :  { %1848 = dma.done.wait [#allocation8], 7168  }
  0x12   :  { %1849 = vsyncadd [#allocation8], 4294960128 }
  0x13   :  { %68 = sfence }
  0x14   :  { %v69_v0 = vld [vmem:[#allocation6 + $0x33] sm:$0xf]  ;;  %vm83_vm0 = vcmask 1043456   ;;  %v77_v1 = vld [vmem:[%s2316_s1] sm:$0xff]  ;;  %vm79_vm1 = vcmask 31744   ;;  %vm107_vm2 = vcmask 261120  }
  0x15   :  { %1331 = vmatpush.msk.msra.mxu0 %vm83_vm0, %v69_v0  ;;  %v73_v2 = vld [vmem:[#allocation6 + $0x37] sm:$0xf]  ;;  %v143_v3 = vld [vmem:[%s2317_s2] sm:$0xf]  ;;  %v1581_v7 = vld [vmem:[#allocation6 + $0x6] ss:$0 sm:$0xff] }
  0x16   :  { %1332 = vmatmul.msk.f32.vlgmr.msra.gmra.mxu0 %vm79_vm1, %v77_v1  ;;  %1333 = vmatpush.msk.msra.mxu1 %vm83_vm0, %v73_v2  ;;  %v1580_v4 = vld [vmem:[#allocation6 + $0x3] ss:$0 sm:$0xff]  ;;  %vm171_vm3 = vcmask 257024   ;;  %v1955_v12 = vmov 32.0   ;;  %v207_v29 = vld [vmem:[#allocation6 + $0x73] sm:$0xff]  ;;  %v206_v30 = vld [vmem:[#allocation6 + $0x6b] sm:$0xff] }
  0x17   :  { %1334 = vmatmul.msk.f32.vlgmr.msra.gmra.mxu1 %vm79_vm1, %v143_v3  ;;  %1587 = vrcp.f32 %v1955_v12  ;;  %227 = vmatpush.msra.mxu2 %v207_v29  ;;  %v205_v31 = vld [vmem:[#allocation6 + $0x63] sm:$0xff]  ;;  %v2035_v32 = vld [vmem:[#allocation6 + $0x3b] sm:$0xff]  ;;  %v2039_v34 = vld [vmem:[#allocation6 + $0x4b] sm:$0xff]  ;;  %s2051_s1 = sld [smem:[#allocation2]] }
  0x18   :  { %250 = vmatpush.msra.mxu3 %v207_v29  ;;  %v2037_v33 = vld [vmem:[#allocation6 + $0x43] sm:$0xff]  ;;  %v2041_v36 = vld [vmem:[#allocation6 + $0x53] sm:$0xff]  ;;  %v2045_v38 = vld [vmem:[#allocation6 + $0xb] sm:$0x1] }
  0x19   :  { %228 = vmatpush.msra.mxu2 %v206_v30  ;;  %v2043_v37 = vld [vmem:[#allocation6 + $0xa] sm:$0x1]  ;;  %v204_v40 = vld [vmem:[#allocation6 + $0x5b] sm:$0xff]  ;;  %v1582_v53 = vld [vmem:[#allocation6 + $0x4] ss:$0 sm:$0xff] }
  0x1a   :  { %251 = vmatpush.msra.mxu3 %v206_v30  ;;  %v1583_v57 = vld [vmem:[#allocation6 + $0x5] ss:$0 sm:$0xff]  ;;  %v1584_v0 = vld [vmem:[#allocation6 + $0x7] ss:$0 sm:$0xff]  ;;  %v2057_v12 = vld [vmem:[#allocation6 + $0x13] sm:$0xff] }
  0x1b   :  { %229 = vmatpush.msra.mxu2 %v205_v31 }
  0x1c   :  { %252 = vmatpush.msra.mxu3 %v205_v31 }
  0x1d   :  { %v1588_v13 = vpop.eup %1587  ;;  %230 = vmatpush.msra.mxu2 %v204_v40  ;;  %p1337_p0 = scmp.le.s32.totalorder %s2051_s1, 0 }
  0x1e   :  { %v112_v14 = vmul.f32 32.0, %v1588_v13  ;;  %vm116_vm4 = vweird.f32 %v1588_v13  ;;  %253 = vmatpush.msra.mxu3 %v204_v40  ;;  %s2074_s2 = smov (!%p1337_p0), 0  }
  0x20   :  { %v113_v15 = vsub.f32 1.0, %v112_v14 }
  0x22   :  { %v114_v16 = vmul.f32 %v1588_v13, %v113_v15  ;;  %v2064_v15 = vld [vmem:[#allocation6 + $0x23] sm:$0xff] }
  0x24   :  { %v115_v17 = vadd.f32 %v1588_v13, %v114_v16  ;;  %v2066_v16 = vld [vmem:[#allocation6 + $0x2b] sm:$0xff] }
  0x26   :  { %v2029_v18 = vsel %vm116_vm4, %v1588_v13, %v115_v17  ;;  %v2059_v13 = vld [vmem:[#allocation6 + $0x1b] sm:$0xff]  ;;  %v1586_v17 = vld [vmem:[#allocation6 + $0x9] ss:$0 sm:$0xff] }
  0x93   :  { %v104_v5 = vpop.f32.mrf.mxu0 }
  0x94   :  { %v105_v6 = vadd.f32 %v1580_v4, %v104_v5  ;;  %v168_v8 = vpop.f32.mrf.mxu1  ;;  %v1585_v4 = vld [vmem:[#allocation6 + $0x8] ss:$0 sm:$0xff] }
  0x95   :  { %v169_v10 = vadd.f32 %v1581_v7, %v168_v8 }
  0x96   :  { %v108_v9 = vsel %vm107_vm2, %v105_v6, 0.0 }
  0x97   :  { %109 = vadd.xlane.f32.xlu0 %v108_v9  ;;  %v172_v11 = vsel %vm171_vm3, %v169_v10, 0.0  ;;  %v2053_v9 = vld [vmem:[#allocation6] sm:$0x1] }
  0x9f   :  { %173 = vadd.xlane.f32.xlu0 %v172_v11  ;;  %v2055_v11 = vld [vmem:[#allocation6 + $0x2] sm:$0x1] }
 0x10a   :  { %v110_v19 = vpop.xlane.xlu0 %109 }
 0x10b   :  { %v118_v20 = vmul.f32 %v2029_v18, %v110_v19 }
 0x10d   :  { %v119_v21 = vsub.f32 %v105_v6, %v118_v20 }
 0x10f   :  { %v120_v22 = vmul.f32 %v119_v21, %v119_v21 }
 0x111   :  { %v121_v23 = vsel %vm107_vm2, %v120_v22, 0.0 }
 0x112   :  { %122 = vadd.xlane.f32.xlu1 %v121_v23  ;;  %v174_v24 = vpop.xlane.xlu0 %173  ;;  %v1866_v23 = vmov 0.0  }
 0x113   :  { %v175_v25 = vmul.f32 %v174_v24, %v2029_v18 }
 0x115   :  { %v176_v26 = vsub.f32 %v169_v10, %v175_v25  ;;  %v259_v10 = vld [vmem:[#allocation6 + $0x1] sm:$0x1] }
 0x116   :  { %v2062_v14 = vadd.f32 %v259_v10, %v2053_v9  }
 0x117   :  { %v177_v27 = vmul.f32 %v176_v26, %v176_v26 }
 0x119   :  { %v178_v28 = vsel %vm171_vm3, %v177_v27, 0.0 }
 0x11a   :  { %179 = vadd.xlane.f32.xlu1 %v178_v28 }
 0x185   :  { %v123_v35 = vpop.xlane.xlu1 %122 }
 0x186   :  { %v124_v39 = vmul.f32 %v123_v35, %v2029_v18 }
 0x188   :  { %v125_v41 = vadd.f32 1e-05, %v124_v39 }
 0x18a   :  { %1589 = vrsqrt.f32 %v125_v41  ;;  %vm132_vm6 = vweird.f32 %v125_v41 }
 0x18d   :  { %v180_v42 = vpop.xlane.xlu1 %179 }
 0x18e   :  { %v181_v43 = vmul.f32 %v180_v42, %v2029_v18 }
 0x190   :  { %v1590_v44 = vpop.eup %1589  ;;  %v182_v45 = vadd.f32 1e-05, %v181_v43 }
 0x191   :  { %v127_v46 = vmul.f32 %v1590_v44, %v125_v41  ;;  %vm133_vm5 = vweird.f32 %v1590_v44 }
 0x192   :  { %1591 = vrsqrt.f32 %v182_v45  ;;  %vm134_vm7 = vmor %vm132_vm6, %vm133_vm5  ;;  %vm189_vm9 = vweird.f32 %v182_v45 }
 0x193   :  { %v128_v47 = vmul.f32 %v1590_v44, %v127_v46 }
 0x195   :  { %v129_v48 = vmul.f32 0.5, %v128_v47 }
 0x197   :  { %v130_v49 = vsub.f32 1.5, %v129_v48 }
 0x198   :  { %v1592_v50 = vpop.eup %1591 }
 0x199   :  { %v131_v51 = vmul.f32 %v1590_v44, %v130_v49  ;;  %v184_v52 = vmul.f32 %v1592_v50, %v182_v45  ;;  %vm190_vm8 = vweird.f32 %v1592_v50 }
 0x19a   :  { %vm191_vm10 = vmor %vm189_vm9, %vm190_vm8 }
 0x19b   :  { %v135_v54 = vsel %vm134_vm7, %v1590_v44, %v131_v51  ;;  %v185_v55 = vmul.f32 %v1592_v50, %v184_v52 }
 0x19c   :  { %v136_v56 = vmul.f32 %v135_v54, %v119_v21 }
 0x19d   :  { %v186_v58 = vmul.f32 0.5, %v185_v55 }
 0x19e   :  { %v138_v59 = vmul.f32 %v1582_v53, %v136_v56 }
 0x19f   :  { %v187_v60 = vsub.f32 1.5, %v186_v58 }
 0x1a0   :  { %v140_v61 = vadd.f32 %v1583_v57, %v138_v59 }
 0x1a1   :  { %v188_v62 = vmul.f32 %v1592_v50, %v187_v60 }
 0x1a2   :  { %v141_v63 = vmul.f32 0.01, %v140_v61 }
 0x1a3   :  { %v192_v1 = vsel %vm191_vm10, %v1592_v50, %v188_v62 }
 0x1a4   :  { %v193_v2 = vmul.f32 %v192_v1, %v176_v26  ;;  %v142_v3 = vmax.f32 %v140_v61, %v141_v63 }
 0x1a6   :  { %1335 = vmatmul.msk.f32.vlgmr.msra.gmra.mxu2 %vm107_vm2, %v142_v3  ;;  %v195_v5 = vmul.f32 %v1584_v0, %v193_v2 }
 0x1a8   :  { %v197_v6 = vadd.f32 %v1585_v4, %v195_v5 }
 0x1aa   :  { %v198_v7 = vmul.f32 0.01, %v197_v6 }
 0x1ac   :  { %v199_v8 = vmax.f32 %v197_v6, %v198_v7 }
 0x1ae   :  { %1336 = vmatmul.msk.f32.vlgmr.msra.gmra.mxu3 %vm107_vm2, %v199_v8 }
 0x229   :  { %v232_v19 = vpop.f32.mrf.mxu2 }
 0x22a   :  { %v2068_v20 = vadd.f32 %v1586_v17, %v232_v19 }
 0x22e   :  { %1269 = sbr.rel (%p1337_p0) target bundleno = 1169 (0x491), region = 96 }
 0x231   :  { %v255_v21 = vpop.f32.mrf.mxu3 }
 0x232   :  { %v2070_v22 = vadd.f32 %v1586_v17, %v255_v21 }
 0x233   :  { %v1854_v24 = vmov %v2062_v14   ;;  %v1858_v25 = vmov 0.0  }
 0x234 LB: > { %293 = vmatpush.msra.mxu0 %v2066_v16  ;;  %s1956_s14 = smov 96   ;;  %v326_v27 = vadd.f32 %v1856_v24, %v2053_v9   ;;  %v275_v28 = vperm.slane %v2055_v11, 0  ;;  %s1957_s15 = smov 64   ;;  %v301_v31 = vperm.slane %v1856_v24, 0  ;;  %s1864_s2 = sphi %s2074_s2, %s270_s2   ;;  %v1860_v25 = vphi %v1858_v25, %v1859_v25   ;;  %v1856_v24 = vphi %v1854_v24, %v1855_v24  }
 0x235   : > { %277 = vrot.lane.b32.xlu0 %v1860_v25, %s1956_s14  ;;  %s270_s2 = sadd.s32 1, %s1864_s2  }
 0x236   : > { %294 = vmatpush.msra.mxu0 %v2064_v15  ;;  %p269_p1 = scmp.ge.s32.totalorder %s270_s2, %s2051_s1  ;;  %v1855_v24 = vmov %v326_v27  }
 0x238   : > { %295 = vmatpush.msra.mxu0 %v2059_v13 }
 0x23a   : > { %296 = vmatpush.msra.mxu0 %v2057_v12 }
 0x2a7   : > { %v278_v26 = vpop.permute.xlu0 %277 }
 0x2a8   : > { %1338 = vmatmul.msk.f32.vlgmr.msra.gmra.mxu0 %vm107_vm2, %v278_v26 }
 0x325   : > { %v298_v29 = vpop.f32.mrf.mxu0 }
 0x326   : > { %v299_v30 = vadd.f32 %v298_v29, %v275_v28 }
 0x328   : > { %308 = vrot.lane.b32.xlu0 %v299_v30, %s1957_s15  ;;  %v302_v35 = vadd.f32 %v301_v31, %v299_v30 }
 0x32a   : > { %v303_v39 = vmul.f32 0.5, %v302_v35 }
 0x32c   : > { %1593 = vtanh.f32 %v303_v39 }
 0x332   : > { %v1594_v40 = vpop.eup %1593 }
 0x333   : > { %v305_v41 = vadd.f32 1.0, %v1594_v40 }
 0x335   : > { %v306_v42 = vmul.f32 0.5, %v305_v41 }
 0x337   : > { %v318_v48 = vsub.f32 1.0, %v306_v42  ;;  %v324_v50 = vmul.f32 %v1860_v25, %v306_v42 }
 0x39a   : > { %v309_v43 = vpop.permute.xlu0 %308 }
 0x39b   : > { %v311_v44 = vmul.f32 %v309_v43, %v306_v42 }
 0x39d   : > { %313 = vrot.lane.b32.xlu1 %v311_v44, %s1957_s15 }
 0x40f   : > { %v314_v45 = vpop.permute.xlu1 %313 }
 0x410   : > { %v316_v46 = vadd.f32 %v314_v45, %v301_v31 }
 0x412   : > { %1595 = vtanh.f32 %v316_v46 }
 0x418   : > { %v1596_v47 = vpop.eup %1595 }
 0x419   : > { %320 = vrot.lane.b32.xlu1 %v1596_v47, %s1956_s14 }
 0x48b   : > { %v321_v49 = vpop.permute.xlu1 %320 }
 0x48c   : > { %v323_v51 = vmul.f32 %v321_v49, %v318_v48  ;;  %272 = sbr.rel (!%p269_p1) target bundleno = 564 (0x234), region = 102 }
 0x48e   : > { %v325_v52 = vadd.f32 %v324_v50, %v323_v51  }
 0x490   : > { %v1859_v25 = vmov %v325_v52   ;;  %v1867_v23 = vmov (%p269_p1), %v325_v52  }
 0x491 PF:  { %344 = vmatpush.msra.mxu0 %v2041_v36  ;;  %s1958_s16 = smov 96   ;;  %vm352_vm11 = vcmask 254976   ;;  %s2099_s17 = sld [smem:[#allocation2 + $0x1]]  ;;  %v2103_v7 = vperm.slane %v2043_v37, 0  ;;  %v2106_v10 = vperm.slane %v2045_v38, 0  ;;  %v1868_v23 = vphi %v1866_v23, %v1867_v23  }
 0x492   :  { %328 = vrot.lane.b32.xlu0 %v1868_v23, %s1958_s16 }
 0x493   :  { %345 = vmatpush.msra.mxu0 %v2039_v34 }
 0x495   :  { %346 = vmatpush.msra.mxu0 %v2037_v33 }
 0x497   :  { %347 = vmatpush.msra.mxu0 %v2035_v32  ;;  %p1341_p2 = scmp.le.s32.totalorder %s2099_s17, 0 }
 0x498   :  { %s2112_s18 = smov (!%p1341_p2), 0  }
 0x504   :  { %v329_v53 = vpop.permute.xlu0 %328 }
 0x505   :  { %1339 = vmatmul.msk.f32.vlgmr.msra.gmra.mxu0 %vm107_vm2, %v329_v53 }
 0x582   :  { %v349_v54 = vpop.f32.mrf.mxu0 }
 0x583   :  { %v350_v55 = vadd.f32 %v349_v54, %v2068_v20 }
 0x585   :  { %v353_v56 = vsel %vm352_vm11, %v350_v55, 0.0 }
 0x586   :  { %354 = vadd.xlane.f32.xlu0 %v353_v56 }
 0x5f9   :  { %v355_v57 = vpop.xlane.xlu0 %354 }
 0x5fa   :  { %v356_v58 = vmul.f32 %v355_v57, %v2029_v18 }
 0x5fc   :  { %v357_v59 = vsub.f32 %v350_v55, %v356_v58 }
 0x5fe   :  { %v358_v60 = vmul.f32 %v357_v59, %v357_v59 }
 0x600   :  { %v359_v61 = vsel %vm352_vm11, %v358_v60, 0.0 }
 0x601   :  { %360 = vadd.xlane.f32.xlu1 %v359_v61 }
 0x674   :  { %v361_v62 = vpop.xlane.xlu1 %360 }
 0x675   :  { %v362_v63 = vmul.f32 %v361_v62, %v2029_v18 }
 0x677   :  { %v363_v0 = vadd.f32 1e-05, %v362_v63 }
 0x679   :  { %1597 = vrsqrt.f32 %v363_v0  ;;  %vm370_vm13 = vweird.f32 %v363_v0 }
 0x67f   :  { %v1598_v1 = vpop.eup %1597 }
 0x680   :  { %v365_v2 = vmul.f32 %v1598_v1, %v363_v0  ;;  %vm371_vm12 = vweird.f32 %v1598_v1 }
 0x681   :  { %vm372_vm14 = vmor %vm370_vm13, %vm371_vm12 }
 0x682   :  { %v366_v3 = vmul.f32 %v1598_v1, %v365_v2 }
 0x684   :  { %v367_v4 = vmul.f32 0.5, %v366_v3 }
 0x686   :  { %v368_v5 = vsub.f32 1.5, %v367_v4 }
 0x688   :  { %v369_v6 = vmul.f32 %v1598_v1, %v368_v5 }
 0x68a   :  { %v373_v8 = vsel %vm372_vm14, %v1598_v1, %v369_v6 }
 0x68b   :  { %v374_v17 = vmul.f32 %v373_v8, %v357_v59 }
 0x68d   :  { %v376_v19 = vmul.f32 %v2103_v7, %v374_v17 }
 0x68f   :  { %v378_v21 = vadd.f32 %v2106_v10, %v376_v19 }
 0x691   :  { %v379_v23 = vmul.f32 0.01, %v378_v21  ;;  %1280 = sbr.rel (%p1341_p2) target bundleno = 2282 (0x8ea), region = 107 }
 0x693   :  { %v380_v24 = vmax.f32 %v378_v21, %v379_v23  }
 0x695   :  { %v1882_v25 = vmov %v380_v24  }
 0x696   :  { %v1870_v26 = vmov %v2062_v14   ;;  %v1874_v37 = vmov %v380_v24  }
 0x697 LB: > { %406 = vmatpush.msra.mxu0 %v2066_v16  ;;  %v442_v38 = vadd.f32 %v1872_v26, %v2053_v9   ;;  %v390_v27 = vperm.slane %v2055_v11, 0  ;;  %s1959_s19 = smov 64   ;;  %v414_v30 = vperm.slane %v1872_v26, 0  ;;  %s1960_s20 = smov 96   ;;  %s1880_s18 = sphi %s2112_s18, %s385_s18   ;;  %v1876_v37 = vphi %v1874_v37, %v1875_v37   ;;  %v1872_v26 = vphi %v1870_v26, %v1871_v26  }
 0x698   : > { %s1961_s21 = smov 32   ;;  %s385_s18 = sadd.s32 1, %s1880_s18  }
 0x699   : > { %407 = vmatpush.msra.mxu0 %v2064_v15  ;;  %p384_p3 = scmp.ge.s32.totalorder %s385_s18, %s2099_s17  ;;  %v1871_v26 = vmov %v442_v38  }
 0x69b   : > { %408 = vmatpush.msra.mxu0 %v2059_v13 }
 0x69d   : > { %409 = vmatpush.msra.mxu0 %v2057_v12 }
 0x69e   : > { %1342 = vmatmul.msk.f32.vlgmr.msra.gmra.mxu0 %vm107_vm2, %v1876_v37 }
 0x71b   : > { %v411_v28 = vpop.f32.mrf.mxu0 }
 0x71c   : > { %v412_v29 = vadd.f32 %v411_v28, %v390_v27 }
 0x71e   : > { %421 = vrot.lane.b32.xlu0 %v412_v29, %s1959_s19  ;;  %v415_v31 = vadd.f32 %v414_v30, %v412_v29 }
 0x720   : > { %v416_v35 = vmul.f32 0.5, %v415_v31 }
 0x722   : > { %1599 = vtanh.f32 %v416_v35 }
 0x728   : > { %v1600_v39 = vpop.eup %1599 }
 0x729   : > { %v418_v40 = vadd.f32 1.0, %v1600_v39 }
 0x72b   : > { %v419_v41 = vmul.f32 0.5, %v418_v40 }
 0x72d   : > { %v431_v48 = vsub.f32 1.0, %v419_v41 }
 0x790   : > { %v422_v42 = vpop.permute.xlu0 %421 }
 0x791   : > { %v424_v43 = vmul.f32 %v422_v42, %v419_v41 }
 0x793   : > { %426 = vrot.lane.b32.xlu0 %v424_v43, %s1959_s19 }
 0x805   : > { %v427_v44 = vpop.permute.xlu0 %426 }
 0x806   : > { %v429_v45 = vadd.f32 %v427_v44, %v414_v30 }
 0x808   : > { %1601 = vtanh.f32 %v429_v45 }
 0x80e   : > { %v1602_v46 = vpop.eup %1601 }
 0x80f   : > { %433 = vrot.lane.b32.xlu1 %v1602_v46, %s1960_s20 }
 0x817   : > { %437 = vrot.lane.b32.xlu1 %v1876_v37, %s1961_s21 }
 0x881   : > { %v434_v47 = vpop.permute.xlu1 %433 }
 0x882   : > { %v436_v50 = vmul.f32 %v434_v47, %v431_v48 }
 0x889   : > { %v438_v49 = vpop.permute.xlu1 %437 }
 0x88a   : > { %v440_v51 = vmul.f32 %v438_v49, %v419_v41 }
 0x88c   : > { %v441_v52 = vadd.f32 %v440_v51, %v436_v50 }
 0x88e   : > { %444 = vrot.lane.b32.xlu2 %v441_v52, %s1960_s20 }
 0x8e5   :  { %387 = sbr.rel (!%p384_p3) target bundleno = 1687 (0x697), region = 113 }
 0x8e8   : > { %v445_v53 = vpop.permute.xlu2 %444  }
 0x8e9   : > { %v1875_v37 = vmov %v445_v53   ;;  %v1883_v25 = vmov (%p384_p3), %v445_v53  }
 0x8ea PF:  { %465 = vmatpush.msra.mxu0 %v2041_v36  ;;  %v448_v54 = vrot.slane %v2068_v20, 2  ;;  %s2137_s22 = sld [smem:[#allocation2 + $0x2]]  ;;  %v1884_v25 = vphi %v1882_v25, %v1883_v25  }
 0x8ec   :  { %466 = vmatpush.msra.mxu0 %v2039_v34 }
 0x8ee   :  { %467 = vmatpush.msra.mxu0 %v2037_v33 }
 0x8f0   :  { %468 = vmatpush.msra.mxu0 %v2035_v32  ;;  %p1345_p4 = scmp.le.s32.totalorder %s2137_s22, 0 }
 0x8f1   :  { %1343 = vmatmul.msk.f32.vlgmr.msra.gmra.mxu0 %vm107_vm2, %v1884_v25  ;;  %s2144_s23 = smov (!%p1345_p4), 0  }
 0x96e   :  { %v470_v55 = vpop.f32.mrf.mxu0 }
 0x96f   :  { %v471_v56 = vadd.f32 %v470_v55, %v448_v54 }
 0x971   :  { %v473_v57 = vsel %vm352_vm11, %v471_v56, 0.0 }
 0x972   :  { %474 = vadd.xlane.f32.xlu0 %v473_v57 }
 0x9e5   :  { %v475_v58 = vpop.xlane.xlu0 %474 }
 0x9e6   :  { %v476_v59 = vmul.f32 %v475_v58, %v2029_v18 }
 0x9e8   :  { %v477_v60 = vsub.f32 %v471_v56, %v476_v59 }
 0x9ea   :  { %v478_v61 = vmul.f32 %v477_v60, %v477_v60 }
 0x9ec   :  { %v479_v62 = vsel %vm352_vm11, %v478_v61, 0.0 }
 0x9ed   :  { %480 = vadd.xlane.f32.xlu0 %v479_v62 }
 0xa60   :  { %v481_v63 = vpop.xlane.xlu0 %480 }
 0xa61   :  { %v482_v0 = vmul.f32 %v481_v63, %v2029_v18 }
 0xa63   :  { %v483_v1 = vadd.f32 1e-05, %v482_v0 }
 0xa65   :  { %1603 = vrsqrt.f32 %v483_v1  ;;  %vm490_vm0 = vweird.f32 %v483_v1 }
 0xa6b   :  { %v1604_v2 = vpop.eup %1603 }
 0xa6c   :  { %v485_v3 = vmul.f32 %v1604_v2, %v483_v1  ;;  %vm491_vm15 = vweird.f32 %v1604_v2 }
 0xa6d   :  { %vm492_vm1 = vmor %vm490_vm0, %vm491_vm15 }
 0xa6e   :  { %v486_v4 = vmul.f32 %v1604_v2, %v485_v3 }
 0xa70   :  { %v487_v5 = vmul.f32 0.5, %v486_v4 }
 0xa72   :  { %v488_v6 = vsub.f32 1.5, %v487_v5 }
 0xa74   :  { %v489_v8 = vmul.f32 %v1604_v2, %v488_v6 }
 0xa76   :  { %v493_v17 = vsel %vm492_vm1, %v1604_v2, %v489_v8 }
 0xa77   :  { %v494_v19 = vmul.f32 %v493_v17, %v477_v60 }
 0xa79   :  { %v495_v21 = vmul.f32 %v494_v19, %v2103_v7 }
 0xa7b   :  { %v496_v23 = vadd.f32 %v495_v21, %v2106_v10 }
 0xa7d   :  { %v497_v24 = vmul.f32 0.01, %v496_v23  ;;  %1291 = sbr.rel (%p1345_p4) target bundleno = 3286 (0xcd6), region = 118 }
 0xa7f   :  { %v498_v25 = vmax.f32 %v496_v23, %v497_v24  }
 0xa81   :  { %v1898_v26 = vmov %v498_v25  }
 0xa82   :  { %v1886_v37 = vmov %v2062_v14   ;;  %v1890_v38 = vmov %v498_v25  }
 0xa83 LB: > { %524 = vmatpush.msra.mxu0 %v2066_v16  ;;  %v560_v27 = vadd.f32 %v1888_v37, %v2053_v9   ;;  %v508_v28 = vperm.slane %v2055_v11, 0  ;;  %s1962_s24 = smov 64   ;;  %v532_v31 = vperm.slane %v1888_v37, 0  ;;  %s1963_s25 = smov 96   ;;  %s1896_s23 = sphi %s2144_s23, %s503_s23   ;;  %v1892_v38 = vphi %v1890_v38, %v1891_v38   ;;  %v1888_v37 = vphi %v1886_v37, %v1887_v37  }
 0xa84   : > { %s1964_s26 = smov 32   ;;  %s503_s23 = sadd.s32 1, %s1896_s23  }
 0xa85   : > { %525 = vmatpush.msra.mxu0 %v2064_v15  ;;  %p502_p5 = scmp.ge.s32.totalorder %s503_s23, %s2137_s22  ;;  %v1887_v37 = vmov %v560_v27  }
 0xa87   : > { %526 = vmatpush.msra.mxu0 %v2059_v13 }
 0xa89   : > { %527 = vmatpush.msra.mxu0 %v2057_v12 }
 0xa8a   : > { %1346 = vmatmul.msk.f32.vlgmr.msra.gmra.mxu0 %vm107_vm2, %v1892_v38 }
 0xb07   : > { %v529_v29 = vpop.f32.mrf.mxu0 }
 0xb08   : > { %v530_v30 = vadd.f32 %v529_v29, %v508_v28 }
 0xb0a   : > { %539 = vrot.lane.b32.xlu0 %v530_v30, %s1962_s24  ;;  %v533_v35 = vadd.f32 %v532_v31, %v530_v30 }
 0xb0c   : > { %v534_v39 = vmul.f32 0.5, %v533_v35 }
 0xb0e   : > { %1605 = vtanh.f32 %v534_v39 }
 0xb14   : > { %v1606_v40 = vpop.eup %1605 }
 0xb15   : > { %v536_v41 = vadd.f32 1.0, %v1606_v40 }
 0xb17   : > { %v537_v42 = vmul.f32 0.5, %v536_v41 }
 0xb19   : > { %v549_v49 = vsub.f32 1.0, %v537_v42 }
 0xb7c   : > { %v540_v43 = vpop.permute.xlu0 %539 }
 0xb7d   : > { %v542_v44 = vmul.f32 %v540_v43, %v537_v42 }
 0xb7f   : > { %544 = vrot.lane.b32.xlu0 %v542_v44, %s1962_s24 }
 0xbf1   : > { %v545_v45 = vpop.permute.xlu0 %544 }
 0xbf2   : > { %v547_v46 = vadd.f32 %v545_v45, %v532_v31 }
 0xbf4   : > { %1607 = vtanh.f32 %v547_v46 }
 0xbfa   : > { %v1608_v47 = vpop.eup %1607 }
 0xbfb   : > { %551 = vrot.lane.b32.xlu1 %v1608_v47, %s1963_s25 }
 0xc03   : > { %555 = vrot.lane.b32.xlu1 %v1892_v38, %s1964_s26 }
 0xc6d   : > { %v552_v48 = vpop.permute.xlu1 %551 }
 0xc6e   : > { %v554_v51 = vmul.f32 %v552_v48, %v549_v49 }
 0xc75   : > { %v556_v50 = vpop.permute.xlu1 %555 }
 0xc76   : > { %v558_v52 = vmul.f32 %v556_v50, %v537_v42 }
 0xc78   : > { %v559_v53 = vadd.f32 %v558_v52, %v554_v51 }
 0xc7a   : > { %562 = vrot.lane.b32.xlu2 %v559_v53, %s1963_s25 }
 0xcd1   :  { %505 = sbr.rel (!%p502_p5) target bundleno = 2691 (0xa83), region = 124 }
 0xcd4   : > { %v563_v54 = vpop.permute.xlu2 %562  }
 0xcd5   : > { %v1891_v38 = vmov %v563_v54   ;;  %v1899_v26 = vmov (%p502_p5), %v563_v54  }
 0xcd6 PF:  { %582 = vmatpush.msra.mxu0 %v2041_v36  ;;  %v565_v55 = vrot.slane %v2068_v20, 4  ;;  %s2169_s27 = sld [smem:[#allocation2 + $0x3]]  ;;  %v1900_v26 = vphi %v1898_v26, %v1899_v26  }
 0xcd8   :  { %583 = vmatpush.msra.mxu0 %v2039_v34 }
 0xcda   :  { %584 = vmatpush.msra.mxu0 %v2037_v33 }
 0xcdc   :  { %585 = vmatpush.msra.mxu0 %v2035_v32  ;;  %p1349_p6 = scmp.le.s32.totalorder %s2169_s27, 0 }
 0xcdd   :  { %1347 = vmatmul.msk.f32.vlgmr.msra.gmra.mxu0 %vm107_vm2, %v1900_v26  ;;  %s2176_s28 = smov (!%p1349_p6), 0  }
 0xd5a   :  { %v587_v56 = vpop.f32.mrf.mxu0 }
 0xd5b   :  { %v588_v57 = vadd.f32 %v587_v56, %v565_v55 }
 0xd5d   :  { %v590_v58 = vsel %vm352_vm11, %v588_v57, 0.0 }
 0xd5e   :  { %591 = vadd.xlane.f32.xlu0 %v590_v58 }
 0xdd1   :  { %v592_v59 = vpop.xlane.xlu0 %591 }
 0xdd2   :  { %v593_v60 = vmul.f32 %v592_v59, %v2029_v18 }
 0xdd4   :  { %v594_v61 = vsub.f32 %v588_v57, %v593_v60 }
 0xdd6   :  { %v595_v62 = vmul.f32 %v594_v61, %v594_v61 }
 0xdd8   :  { %v596_v63 = vsel %vm352_vm11, %v595_v62, 0.0 }
 0xdd9   :  { %597 = vadd.xlane.f32.xlu0 %v596_v63 }
 0xe4c   :  { %v598_v0 = vpop.xlane.xlu0 %597 }
 0xe4d   :  { %v599_v1 = vmul.f32 %v598_v0, %v2029_v18 }
 0xe4f   :  { %v600_v2 = vadd.f32 1e-05, %v599_v1 }
 0xe51   :  { %1609 = vrsqrt.f32 %v600_v2  ;;  %vm607_vm4 = vweird.f32 %v600_v2 }
 0xe57   :  { %v1610_v3 = vpop.eup %1609 }
 0xe58   :  { %v602_v4 = vmul.f32 %v1610_v3, %v600_v2  ;;  %vm608_vm3 = vweird.f32 %v1610_v3 }
 0xe59   :  { %vm609_vm5 = vmor %vm607_vm4, %vm608_vm3 }
 0xe5a   :  { %v603_v5 = vmul.f32 %v1610_v3, %v602_v4 }
 0xe5c   :  { %v604_v6 = vmul.f32 0.5, %v603_v5 }
 0xe5e   :  { %v605_v8 = vsub.f32 1.5, %v604_v6 }
 0xe60   :  { %v606_v17 = vmul.f32 %v1610_v3, %v605_v8 }
 0xe62   :  { %v610_v19 = vsel %vm609_vm5, %v1610_v3, %v606_v17 }
 0xe63   :  { %v611_v21 = vmul.f32 %v610_v19, %v594_v61 }
 0xe65   :  { %v612_v23 = vmul.f32 %v611_v21, %v2103_v7 }
 0xe67   :  { %v613_v24 = vadd.f32 %v612_v23, %v2106_v10 }
 0xe69   :  { %v614_v25 = vmul.f32 0.01, %v613_v24  ;;  %1302 = sbr.rel (%p1349_p6) target bundleno = 4290 (0x10c2), region = 129 }
 0xe6b   :  { %v615_v26 = vmax.f32 %v613_v24, %v614_v25  }
 0xe6d   :  { %v1914_v37 = vmov %v615_v26  }
 0xe6e   :  { %v1902_v38 = vmov %v2062_v14   ;;  %v1906_v27 = vmov %v615_v26  }
 0xe6f LB: > { %641 = vmatpush.msra.mxu0 %v2066_v16  ;;  %v677_v28 = vadd.f32 %v1904_v38, %v2053_v9   ;;  %v625_v29 = vperm.slane %v2055_v11, 0  ;;  %s1965_s29 = smov 64   ;;  %v649_v35 = vperm.slane %v1904_v38, 0  ;;  %s1966_s30 = smov 96   ;;  %s1912_s28 = sphi %s2176_s28, %s620_s28   ;;  %v1908_v27 = vphi %v1906_v27, %v1907_v27   ;;  %v1904_v38 = vphi %v1902_v38, %v1903_v38  }
 0xe70   : > { %s1967_s7 = smov 32   ;;  %s620_s28 = sadd.s32 1, %s1912_s28  }
 0xe71   : > { %642 = vmatpush.msra.mxu0 %v2064_v15  ;;  %p619_p7 = scmp.ge.s32.totalorder %s620_s28, %s2169_s27  ;;  %v1903_v38 = vmov %v677_v28  }
 0xe73   : > { %643 = vmatpush.msra.mxu0 %v2059_v13 }
 0xe75   : > { %644 = vmatpush.msra.mxu0 %v2057_v12 }
 0xe76   : > { %1350 = vmatmul.msk.f32.vlgmr.msra.gmra.mxu0 %vm107_vm2, %v1908_v27 }
 0xef3   : > { %v646_v30 = vpop.f32.mrf.mxu0 }
 0xef4   : > { %v647_v31 = vadd.f32 %v646_v30, %v625_v29 }
 0xef6   : > { %656 = vrot.lane.b32.xlu0 %v647_v31, %s1965_s29  ;;  %v650_v39 = vadd.f32 %v649_v35, %v647_v31 }
 0xef8   : > { %v651_v40 = vmul.f32 0.5, %v650_v39 }
 0xefa   : > { %1611 = vtanh.f32 %v651_v40 }
 0xf00   : > { %v1612_v41 = vpop.eup %1611 }
 0xf01   : > { %v653_v42 = vadd.f32 1.0, %v1612_v41 }
 0xf03   : > { %v654_v43 = vmul.f32 0.5, %v653_v42 }
 0xf05   : > { %v666_v50 = vsub.f32 1.0, %v654_v43 }
 0xf68   : > { %v657_v44 = vpop.permute.xlu0 %656 }
 0xf69   : > { %v659_v45 = vmul.f32 %v657_v44, %v654_v43 }
 0xf6b   : > { %661 = vrot.lane.b32.xlu0 %v659_v45, %s1965_s29 }
 0xfdd   : > { %v662_v46 = vpop.permute.xlu0 %661 }
 0xfde   : > { %v664_v47 = vadd.f32 %v662_v46, %v649_v35 }
 0xfe0   : > { %1613 = vtanh.f32 %v664_v47 }
 0xfe6   : > { %v1614_v48 = vpop.eup %1613 }
 0xfe7   : > { %668 = vrot.lane.b32.xlu1 %v1614_v48, %s1966_s30 }
 0xfef   : > { %672 = vrot.lane.b32.xlu1 %v1908_v27, %s1967_s7 }
0x1059   : > { %v669_v49 = vpop.permute.xlu1 %668 }
0x105a   : > { %v671_v52 = vmul.f32 %v669_v49, %v666_v50 }
0x1061   : > { %v673_v51 = vpop.permute.xlu1 %672 }
0x1062   : > { %v675_v53 = vmul.f32 %v673_v51, %v654_v43 }
0x1064   : > { %v676_v54 = vadd.f32 %v675_v53, %v671_v52 }
0x1066   : > { %679 = vrot.lane.b32.xlu2 %v676_v54, %s1966_s30 }
0x10bd   :  { %622 = sbr.rel (!%p619_p7) target bundleno = 3695 (0xe6f), region = 135 }
0x10c0   : > { %v680_v55 = vpop.permute.xlu2 %679  }
0x10c1   : > { %v1907_v27 = vmov %v680_v55   ;;  %v1915_v37 = vmov (%p619_p7), %v680_v55  }
0x10c2 PF:  { %699 = vmatpush.msra.mxu0 %v2041_v36  ;;  %v682_v56 = vrot.slane %v2068_v20, 6  ;;  %s2201_s8 = sld [smem:[#allocation2 + $0x4]]  ;;  %v1916_v37 = vphi %v1914_v37, %v1915_v37  }
0x10c4   :  { %700 = vmatpush.msra.mxu0 %v2039_v34 }
0x10c6   :  { %701 = vmatpush.msra.mxu0 %v2037_v33 }
0x10c8   :  { %702 = vmatpush.msra.mxu0 %v2035_v32  ;;  %p1353_p8 = scmp.le.s32.totalorder %s2201_s8, 0 }
0x10c9   :  { %1351 = vmatmul.msk.f32.vlgmr.msra.gmra.mxu0 %vm107_vm2, %v1916_v37  ;;  %s2208_s9 = smov (!%p1353_p8), 0  }
0x1146   :  { %v704_v57 = vpop.f32.mrf.mxu0 }
0x1147   :  { %v705_v58 = vadd.f32 %v704_v57, %v682_v56 }
0x1149   :  { %v707_v59 = vsel %vm352_vm11, %v705_v58, 0.0 }
0x114a   :  { %708 = vadd.xlane.f32.xlu0 %v707_v59 }
0x11bd   :  { %v709_v60 = vpop.xlane.xlu0 %708 }
0x11be   :  { %v710_v61 = vmul.f32 %v709_v60, %v2029_v18 }
0x11c0   :  { %v711_v62 = vsub.f32 %v705_v58, %v710_v61 }
0x11c2   :  { %v712_v63 = vmul.f32 %v711_v62, %v711_v62 }
0x11c4   :  { %v713_v0 = vsel %vm352_vm11, %v712_v63, 0.0 }
0x11c5   :  { %714 = vadd.xlane.f32.xlu0 %v713_v0 }
0x1238   :  { %v715_v1 = vpop.xlane.xlu0 %714 }
0x1239   :  { %v716_v2 = vmul.f32 %v715_v1, %v2029_v18 }
0x123b   :  { %v717_v3 = vadd.f32 1e-05, %v716_v2 }
0x123d   :  { %1615 = vrsqrt.f32 %v717_v3  ;;  %vm724_vm7 = vweird.f32 %v717_v3 }
0x1243   :  { %v1616_v20 = vpop.eup %1615 }
0x1244   :  { %v719_v4 = vmul.f32 %v1616_v20, %v717_v3  ;;  %vm725_vm6 = vweird.f32 %v1616_v20 }
0x1245   :  { %vm726_vm8 = vmor %vm724_vm7, %vm725_vm6 }
0x1246   :  { %v720_v5 = vmul.f32 %v1616_v20, %v719_v4 }
0x1248   :  { %v721_v6 = vmul.f32 0.5, %v720_v5 }
0x124a   :  { %v722_v8 = vsub.f32 1.5, %v721_v6 }
0x124c   :  { %v723_v17 = vmul.f32 %v1616_v20, %v722_v8 }
0x124e   :  { %v727_v19 = vsel %vm726_vm8, %v1616_v20, %v723_v17 }
0x124f   :  { %v728_v21 = vmul.f32 %v727_v19, %v711_v62 }
0x1251   :  { %v729_v23 = vmul.f32 %v728_v21, %v2103_v7 }
0x1253   :  { %v730_v24 = vadd.f32 %v729_v23, %v2106_v10 }
0x1255   :  { %v731_v25 = vmul.f32 0.01, %v730_v24  ;;  %1313 = sbr.rel (%p1353_p8) target bundleno = 5294 (0x14ae), region = 140 }
0x1257   :  { %v732_v26 = vmax.f32 %v730_v24, %v731_v25  }
0x1259   :  { %v1930_v37 = vmov %v732_v26  }
0x125a   :  { %v1918_v38 = vmov %v2062_v14   ;;  %v1922_v27 = vmov %v732_v26  }
0x125b LB: > { %758 = vmatpush.msra.mxu0 %v2066_v16  ;;  %v794_v28 = vadd.f32 %v1920_v38, %v2053_v9   ;;  %v742_v29 = vperm.slane %v2055_v11, 0  ;;  %s1968_s10 = smov 64   ;;  %v766_v35 = vperm.slane %v1920_v38, 0  ;;  %s1969_s0 = smov 96   ;;  %s1928_s9 = sphi %s2208_s9, %s737_s9   ;;  %v1924_v27 = vphi %v1922_v27, %v1923_v27   ;;  %v1920_v38 = vphi %v1918_v38, %v1919_v38  }
0x125c   : > { %s1970_s11 = smov 32   ;;  %s737_s9 = sadd.s32 1, %s1928_s9  }
0x125d   : > { %759 = vmatpush.msra.mxu0 %v2064_v15  ;;  %p736_p9 = scmp.ge.s32.totalorder %s737_s9, %s2201_s8  ;;  %v1919_v38 = vmov %v794_v28  }
0x125f   : > { %760 = vmatpush.msra.mxu0 %v2059_v13 }
0x1261   : > { %761 = vmatpush.msra.mxu0 %v2057_v12 }
0x1262   : > { %1354 = vmatmul.msk.f32.vlgmr.msra.gmra.mxu0 %vm107_vm2, %v1924_v27 }
0x12df   : > { %v763_v30 = vpop.f32.mrf.mxu0 }
0x12e0   : > { %v764_v31 = vadd.f32 %v763_v30, %v742_v29 }
0x12e2   : > { %773 = vrot.lane.b32.xlu0 %v764_v31, %s1968_s10  ;;  %v767_v39 = vadd.f32 %v766_v35, %v764_v31 }
0x12e4   : > { %v768_v40 = vmul.f32 0.5, %v767_v39 }
0x12e6   : > { %1617 = vtanh.f32 %v768_v40 }
0x12ec   : > { %v1618_v41 = vpop.eup %1617 }
0x12ed   : > { %v770_v42 = vadd.f32 1.0, %v1618_v41 }
0x12ef   : > { %v771_v43 = vmul.f32 0.5, %v770_v42 }
0x12f1   : > { %v783_v50 = vsub.f32 1.0, %v771_v43 }
0x1354   : > { %v774_v44 = vpop.permute.xlu0 %773 }
0x1355   : > { %v776_v45 = vmul.f32 %v774_v44, %v771_v43 }
0x1357   : > { %778 = vrot.lane.b32.xlu0 %v776_v45, %s1968_s10 }
0x13c9   : > { %v779_v46 = vpop.permute.xlu0 %778 }
0x13ca   : > { %v781_v47 = vadd.f32 %v779_v46, %v766_v35 }
0x13cc   : > { %1619 = vtanh.f32 %v781_v47 }
0x13d2   : > { %v1620_v48 = vpop.eup %1619 }
0x13d3   : > { %785 = vrot.lane.b32.xlu1 %v1620_v48, %s1969_s0 }
0x13db   : > { %789 = vrot.lane.b32.xlu1 %v1924_v27, %s1970_s11 }
0x1445   : > { %v786_v49 = vpop.permute.xlu1 %785 }
0x1446   : > { %v788_v52 = vmul.f32 %v786_v49, %v783_v50 }
0x144d   : > { %v790_v51 = vpop.permute.xlu1 %789 }
0x144e   : > { %v792_v53 = vmul.f32 %v790_v51, %v771_v43 }
0x1450   : > { %v793_v54 = vadd.f32 %v792_v53, %v788_v52 }
0x1452   : > { %796 = vrot.lane.b32.xlu2 %v793_v54, %s1969_s0 }
0x14a9   :  { %739 = sbr.rel (!%p736_p9) target bundleno = 4699 (0x125b), region = 146 }
0x14ac   : > { %v797_v55 = vpop.permute.xlu2 %796  }
0x14ad   : > { %v1923_v27 = vmov %v797_v55   ;;  %v1931_v37 = vmov (%p736_p9), %v797_v55  }
0x14ae PF:  { %814 = vmatpush.msra.mxu0 %v2041_v36  ;;  %s2236_s3 = sld [smem:[#allocation2 + $0x5]]  ;;  %v1932_v37 = vphi %v1930_v37, %v1931_v37  }
0x14b0   :  { %815 = vmatpush.msra.mxu0 %v2039_v34 }
0x14b2   :  { %816 = vmatpush.msra.mxu0 %v2037_v33 }
0x14b4   :  { %817 = vmatpush.msra.mxu0 %v2035_v32  ;;  %p1357_p10 = scmp.le.s32.totalorder %s2236_s3, 0 }
0x14b5   :  { %1355 = vmatmul.msk.f32.vlgmr.msra.gmra.mxu0 %vm107_vm2, %v1932_v37  ;;  %s2247_s12 = smov (!%p1357_p10), 0  }
0x1532   :  { %v819_v56 = vpop.f32.mrf.mxu0 }
0x1533   :  { %v820_v57 = vadd.f32 %v819_v56, %v2070_v22 }
0x1535   :  { %v822_v58 = vsel %vm352_vm11, %v820_v57, 0.0 }
0x1536   :  { %823 = vadd.xlane.f32.xlu0 %v822_v58 }
0x15a9   :  { %v824_v59 = vpop.xlane.xlu0 %823 }
0x15aa   :  { %v825_v60 = vmul.f32 %v824_v59, %v2029_v18 }
0x15ac   :  { %v826_v61 = vsub.f32 %v820_v57, %v825_v60 }
0x15ae   :  { %v827_v62 = vmul.f32 %v826_v61, %v826_v61 }
0x15b0   :  { %v828_v63 = vsel %vm352_vm11, %v827_v62, 0.0 }
0x15b1   :  { %829 = vadd.xlane.f32.xlu0 %v828_v63 }
0x1624   :  { %v830_v0 = vpop.xlane.xlu0 %829 }
0x1625   :  { %v831_v1 = vmul.f32 %v830_v0, %v2029_v18 }
0x1627   :  { %v832_v2 = vadd.f32 1e-05, %v831_v1 }
0x1629   :  { %1621 = vrsqrt.f32 %v832_v2  ;;  %vm839_vm10 = vweird.f32 %v832_v2 }
0x162f   :  { %v1622_v3 = vpop.eup %1621 }
0x1630   :  { %v834_v20 = vmul.f32 %v1622_v3, %v832_v2  ;;  %vm840_vm9 = vweird.f32 %v1622_v3 }
0x1631   :  { %vm841_vm12 = vmor %vm839_vm10, %vm840_vm9 }
0x1632   :  { %v835_v4 = vmul.f32 %v1622_v3, %v834_v20 }
0x1634   :  { %v836_v5 = vmul.f32 0.5, %v835_v4 }
0x1636   :  { %v837_v6 = vsub.f32 1.5, %v836_v5 }
0x1638   :  { %v838_v8 = vmul.f32 %v1622_v3, %v837_v6 }
0x163a   :  { %v842_v17 = vsel %vm841_vm12, %v1622_v3, %v838_v8 }
0x163b   :  { %v843_v19 = vmul.f32 %v842_v17, %v826_v61 }
0x163d   :  { %v844_v21 = vmul.f32 %v843_v19, %v2103_v7 }
0x163f   :  { %v845_v23 = vadd.f32 %v844_v21, %v2106_v10 }
0x1641   :  { %v846_v24 = vmul.f32 0.01, %v845_v23  ;;  %1324 = sbr.rel (%p1357_p10) target bundleno = 6298 (0x189a), region = 151 }
0x1643   :  { %v2241_v25 = vmax.f32 %v845_v23, %v846_v24  }
0x1645   :  { %v1946_v26 = vmov %v2241_v25  }
0x1646   :  { %v1934_v38 = vmov %v2062_v14   ;;  %v1938_v27 = vmov %v2241_v25  }
0x1647 LB: > { %873 = vmatpush.msra.mxu0 %v2066_v16  ;;  %v909_v14 = vadd.f32 %v1936_v38, %v2053_v9   ;;  %v857_v28 = vperm.slane %v2055_v11, 0  ;;  %s1971_s4 = smov 64   ;;  %v881_v31 = vperm.slane %v1936_v38, 0  ;;  %s1972_s13 = smov 96   ;;  %s1944_s12 = sphi %s2247_s12, %s852_s12   ;;  %v1940_v27 = vphi %v1938_v27, %v1939_v27   ;;  %v1936_v38 = vphi %v1934_v38, %v1935_v38  }
0x1648   : > { %s1973_s1 = smov 32   ;;  %s852_s12 = sadd.s32 1, %s1944_s12  }
0x1649   : > { %874 = vmatpush.msra.mxu0 %v2064_v15  ;;  %p851_p11 = scmp.ge.s32.totalorder %s852_s12, %s2236_s3  ;;  %v1935_v38 = vmov %v909_v14  }
0x164b   : > { %875 = vmatpush.msra.mxu0 %v2059_v13 }
0x164d   : > { %876 = vmatpush.msra.mxu0 %v2057_v12 }
0x164e   : > { %1358 = vmatmul.msk.f32.vlgmr.msra.gmra.mxu0 %vm107_vm2, %v1940_v27 }
0x16cb   : > { %v878_v29 = vpop.f32.mrf.mxu0 }
0x16cc   : > { %v879_v30 = vadd.f32 %v878_v29, %v857_v28 }
0x16ce   : > { %888 = vrot.lane.b32.xlu0 %v879_v30, %s1971_s4  ;;  %v882_v35 = vadd.f32 %v881_v31, %v879_v30 }
0x16d0   : > { %v883_v39 = vmul.f32 0.5, %v882_v35 }
0x16d2   : > { %1623 = vtanh.f32 %v883_v39 }
0x16d8   : > { %v1624_v40 = vpop.eup %1623 }
0x16d9   : > { %v885_v41 = vadd.f32 1.0, %v1624_v40 }
0x16db   : > { %v886_v42 = vmul.f32 0.5, %v885_v41 }
0x16dd   : > { %v898_v49 = vsub.f32 1.0, %v886_v42 }
0x1740   : > { %v889_v43 = vpop.permute.xlu0 %888 }
0x1741   : > { %v891_v44 = vmul.f32 %v889_v43, %v886_v42 }
0x1743   : > { %893 = vrot.lane.b32.xlu0 %v891_v44, %s1971_s4 }
0x17b5   : > { %v894_v45 = vpop.permute.xlu0 %893 }
0x17b6   : > { %v896_v46 = vadd.f32 %v894_v45, %v881_v31 }
0x17b8   : > { %1625 = vtanh.f32 %v896_v46 }
0x17be   : > { %v1626_v47 = vpop.eup %1625 }
0x17bf   : > { %900 = vrot.lane.b32.xlu1 %v1626_v47, %s1972_s13 }
0x17c7   : > { %904 = vrot.lane.b32.xlu1 %v1940_v27, %s1973_s1 }
0x1831   : > { %v901_v48 = vpop.permute.xlu1 %900 }
0x1832   : > { %v903_v51 = vmul.f32 %v901_v48, %v898_v49 }
0x1839   : > { %v905_v50 = vpop.permute.xlu1 %904 }
0x183a   : > { %v907_v52 = vmul.f32 %v905_v50, %v886_v42 }
0x183c   : > { %v908_v53 = vadd.f32 %v907_v52, %v903_v51 }
0x183e   : > { %911 = vrot.lane.b32.xlu2 %v908_v53, %s1972_s13 }
0x1895   :  { %854 = sbr.rel (!%p851_p11) target bundleno = 5703 (0x1647), region = 157 }
0x1898   : > { %v912_v54 = vpop.permute.xlu2 %911  }
0x1899   : > { %v1939_v27 = vmov %v912_v54   ;;  %v1947_v26 = vmov (%p851_p11), %v912_v54  }
0x189a PF:  { %932 = vmatpush.msra.mxu0 %v2041_v36  ;;  %v915_v55 = vrot.slane %v2070_v22, 2  ;;  %v1010_v16 = vld [vmem:[#allocation7 + $0x38] sm:$0xff]  ;;  %v1009_v58 = vld [vmem:[#allocation7 + $0x30] sm:$0xff]  ;;  %v1008_v22 = vld [vmem:[#allocation7 + $0x28] sm:$0xff]  ;;  %vm969_vm0 = vcmask 1041408   ;;  %s1974_s2 = smov 32   ;;  %v1948_v26 = vphi %v1946_v26, %v1947_v26  }
0x189b   :  { %1024 = vmatpush.msra.mxu1 %v1010_v16  ;;  %v1007_v59 = vld [vmem:[#allocation7 + $0x20] sm:$0xff]  ;;  %v1006_v60 = vld [vmem:[#allocation7 + $0x18] sm:$0xff]  ;;  %v1005_v63 = vld [vmem:[#allocation7 + $0x10] sm:$0xff]  ;;  %v967_v40 = vrot.slane %v1948_v26, 6  ;;  %s1975_s14 = smov [#allocation10]   ;;  %s1248_s18 = sshll.u32 %s2321_s6, 4  ;;  %s1249_s18 = int_to_ptr.hbm [resolvable:$true] %s1248_s18 }
0x189c   :  { %933 = vmatpush.msra.mxu0 %v2039_v34  ;;  %v1004_v1 = vld [vmem:[#allocation7 + $0x8] sm:$0xff]  ;;  %v1003_v23 = vld [vmem:[#allocation7] sm:$0xff]  ;;  %v2281_v24 = vld [vmem:[#allocation7 + $0x138] sm:$0xff]  ;;  %s1246_s15 = sshll.u32 %s1975_s14, 4  ;;  %s1976_s19 = smov [#allocation9]   ;;  %vm1228_vm7 = vcmask 125952   ;;  %s1247_s15 = int_to_ptr.vmem [resolvable:$true] %s1246_s15 }
0x189d   :  { %1025 = vmatpush.msra.mxu1 %v1009_v58  ;;  %v2283_v38 = vld [vmem:[#allocation7 + $0x130] sm:$0xff]  ;;  %1036 = vmatpush.msra.mxu2 %v2281_v24  ;;  %v996_v14 = vld [vmem:[#allocation7 + $0x108] sm:$0xff]  ;;  %v995_v28 = vld [vmem:[#allocation7 + $0x100] sm:$0xff]  ;;  %v970_v42 = vsel %vm969_vm0, %v1932_v37, %v967_v40  ;;  %s1235_s20 = sshll.u32 %s1976_s19, 4  ;;  %s1237_s23 = sshll.u32 %s2320_s5, 4  ;;  %s1236_s20 = int_to_ptr.vmem [resolvable:$true] %s1235_s20  ;;  %s1238_s23 = int_to_ptr.hbm [resolvable:$true] %s1237_s23 }
0x189e   :  { %934 = vmatpush.msra.mxu0 %v2037_v33  ;;  %1058 = vmatpush.msra.mxu3 %v2281_v24  ;;  %v997_v27 = vld [vmem:[#allocation7 + $0x110] sm:$0xff]  ;;  %v994_v29 = vld [vmem:[#allocation7 + $0xf8] sm:$0xff]  ;;  %v992_v31 = vld [vmem:[#allocation7 + $0xe8] sm:$0xff] }
0x189f   :  { %1026 = vmatpush.msra.mxu1 %v1008_v22  ;;  %1037 = vmatpush.msra.mxu2 %v2283_v38  ;;  %v993_v30 = vld [vmem:[#allocation7 + $0xf0] sm:$0xff]  ;;  %v991_v35 = vld [vmem:[#allocation7 + $0xe0] sm:$0xff]  ;;  %v990_v39 = vld [vmem:[#allocation7 + $0xd8] sm:$0xff] }
0x18a0   :  { %935 = vmatpush.msra.mxu0 %v2035_v32  ;;  %1059 = vmatpush.msra.mxu3 %v2283_v38  ;;  %v989_v41 = vld [vmem:[#allocation7 + $0xd0] sm:$0xff]  ;;  %v988_v45 = vld [vmem:[#allocation7 + $0xc8] sm:$0xff]  ;;  %v1110_v51 = vld [vmem:[#allocation7 + $0xb8] sm:$0xff] }
0x18a1   :  { %1359 = vmatmul.msk.f32.vlgmr.msra.gmra.mxu0 %vm107_vm2, %v1948_v26  ;;  %1027 = vmatpush.msra.mxu1 %v1007_v59  ;;  %v987_v26 = vld [vmem:[#allocation7 + $0xc0] sm:$0xff]  ;;  %v1627_v37 = vld [vmem:[#allocation6 + $0xc] ss:$0 sm:$0xff]  ;;  %v1109_v52 = vld [vmem:[#allocation7 + $0xb0] sm:$0xff] }
0x18a2   :  { %1112 = vmatpush.msrb.mxu0 %v1110_v51  ;;  %v1108_v53 = vld [vmem:[#allocation7 + $0xa8] sm:$0xff]  ;;  %v1107_v54 = vld [vmem:[#allocation7 + $0xa0] sm:$0xff]  ;;  %v1193_v40 = vld [vmem:[#allocation7 + $0x150] sm:$0xff] }
0x18a3   :  { %1028 = vmatpush.msra.mxu1 %v1006_v60 }
0x18a4   :  { %1113 = vmatpush.msrb.mxu0 %v1109_v52  ;;  %v1632_v52 = vld [vmem:[#allocation6 + $0x11] ss:$0 sm:$0xff] }
0x18a5   :  { %1029 = vmatpush.msra.mxu1 %v1005_v63 }
0x18a6   :  { %1114 = vmatpush.msrb.mxu0 %v1108_v53 }
0x18a7   :  { %1030 = vmatpush.msra.mxu1 %v1004_v1 }
0x18a8   :  { %1115 = vmatpush.msrb.mxu0 %v1107_v54 }
0x18a9   :  { %1031 = vmatpush.msra.mxu1 %v1003_v23 }
0x18ab   :  { %1132 = vmatpush.msrb.mxu1 %v2281_v24 }
0x18ad   :  { %1133 = vmatpush.msrb.mxu1 %v2283_v38 }
0x191e   :  { %v937_v56 = vpop.f32.mrf.mxu0 }
0x191f   :  { %v938_v57 = vadd.f32 %v937_v56, %v915_v55  ;;  %v1106_v55 = vld [vmem:[#allocation7 + $0x98] sm:$0xff]  ;;  %v1105_v56 = vld [vmem:[#allocation7 + $0x90] sm:$0xff] }
0x1920   :  { %1116 = vmatpush.msrb.mxu0 %v1106_v55 }
0x1921   :  { %v940_v9 = vsel %vm352_vm11, %v938_v57, 0.0 }
0x1922   :  { %941 = vadd.xlane.f32.xlu0 %v940_v9  ;;  %1117 = vmatpush.msrb.mxu0 %v1105_v56  ;;  %v1103_v9 = vld [vmem:[#allocation7 + $0x80] sm:$0xff] }
0x1995   :  { %v942_v11 = vpop.xlane.xlu0 %941 }
0x1996   :  { %v943_v12 = vmul.f32 %v942_v11, %v2029_v18  ;;  %v1102_v11 = vld [vmem:[#allocation7 + $0x78] sm:$0xff] }
0x1998   :  { %v944_v36 = vsub.f32 %v938_v57, %v943_v12  ;;  %v1104_v57 = vld [vmem:[#allocation7 + $0x88] sm:$0xff]  ;;  %v1101_v12 = vld [vmem:[#allocation7 + $0x70] sm:$0xff] }
0x1999   :  { %1118 = vmatpush.msrb.mxu0 %v1104_v57  ;;  %v1633_v57 = vld [vmem:[#allocation6 + $0x12] ss:$0 sm:$0xff] }
0x199a   :  { %v945_v13 = vmul.f32 %v944_v36, %v944_v36 }
0x199b   :  { %1119 = vmatpush.msrb.mxu0 %v1103_v9 }
0x199c   :  { %v946_v34 = vsel %vm352_vm11, %v945_v13, 0.0  ;;  %v1099_v13 = vld [vmem:[#allocation7 + $0x60] sm:$0xff] }
0x199d   :  { %947 = vadd.xlane.f32.xlu0 %v946_v34  ;;  %1120 = vmatpush.msrb.mxu0 %v1102_v11  ;;  %v1098_v34 = vld [vmem:[#allocation7 + $0x58] sm:$0xff] }
0x199f   :  { %1121 = vmatpush.msrb.mxu0 %v1101_v12 }
0x1a10   :  { %v948_v33 = vpop.xlane.xlu0 %947 }
0x1a11   :  { %v949_v32 = vmul.f32 %v948_v33, %v2029_v18  ;;  %v1097_v33 = vld [vmem:[#allocation7 + $0x50] sm:$0xff] }
0x1a13   :  { %v950_v15 = vadd.f32 1e-05, %v949_v32  ;;  %v1096_v32 = vld [vmem:[#allocation7 + $0x48] sm:$0xff] }
0x1a15   :  { %1634 = vrsqrt.f32 %v950_v15  ;;  %vm957_vm14 = vweird.f32 %v950_v15 }
0x1a1b   :  { %v1635_v61 = vpop.eup %1634 }
0x1a1c   :  { %v952_v62 = vmul.f32 %v1635_v61, %v950_v15  ;;  %vm958_vm13 = vweird.f32 %v1635_v61  ;;  %v1095_v15 = vld [vmem:[#allocation7 + $0x40] sm:$0xff] }
0x1a1d   :  { %vm959_vm15 = vmor %vm957_vm14, %vm958_vm13 }
0x1a1e   :  { %v953_v0 = vmul.f32 %v1635_v61, %v952_v62 }
0x1a20   :  { %v954_v2 = vmul.f32 0.5, %v953_v0  ;;  %v1628_v0 = vld [vmem:[#allocation6 + $0xd] ss:$0 sm:$0xff] }
0x1a22   :  { %v955_v18 = vsub.f32 1.5, %v954_v2 }
0x1a24   :  { %v956_v3 = vmul.f32 %v1635_v61, %v955_v18  ;;  %v1629_v18 = vld [vmem:[#allocation6 + $0xe] ss:$0 sm:$0xff] }
0x1a26   :  { %v960_v20 = vsel %vm959_vm15, %v1635_v61, %v956_v3 }
0x1a27   :  { %v961_v4 = vmul.f32 %v960_v20, %v944_v36  ;;  %v1100_v36 = vld [vmem:[#allocation7 + $0x68] sm:$0xff] }
0x1a28   :  { %1122 = vmatpush.msrb.mxu0 %v1100_v36 }
0x1a29   :  { %v962_v5 = vmul.f32 %v961_v4, %v2103_v7  ;;  %v2287_v7 = vld [vmem:[#allocation7 + $0x128] sm:$0xff] }
0x1a2a   :  { %1038 = vmatpush.msra.mxu2 %v2287_v7  ;;  %1060 = vmatpush.msra.mxu3 %v2287_v7 }
0x1a2b   :  { %v963_v6 = vadd.f32 %v962_v5, %v2106_v10  ;;  %v2292_v10 = vld [vmem:[#allocation7 + $0x120] sm:$0xff]  ;;  %1134 = vmatpush.msrb.mxu1 %v2287_v7  ;;  %1123 = vmatpush.msrb.mxu0 %v1099_v13 }
0x1a2c   :  { %1039 = vmatpush.msra.mxu2 %v2292_v10  ;;  %1061 = vmatpush.msra.mxu3 %v2292_v10 }
0x1a2d   :  { %v964_v8 = vmul.f32 0.01, %v963_v6  ;;  %1135 = vmatpush.msrb.mxu1 %v2292_v10  ;;  %1124 = vmatpush.msrb.mxu0 %v1098_v34 }
0x1a2f   :  { %v965_v17 = vmax.f32 %v963_v6, %v964_v8  ;;  %1125 = vmatpush.msrb.mxu0 %v1097_v33  ;;  %v1630_v6 = vld [vmem:[#allocation6 + $0xf] ss:$0 sm:$0xff] }
0x1a31   :  { %v972_v19 = vrot.slane %v965_v17, 6  ;;  %966 = vst.msk [vmem:[#allocation10] sm:$0x3] %vm352_vm11, %v965_v17  ;;  %vm1012_vm11 = vcmask 523264   ;;  %1126 = vmatpush.msrb.mxu0 %v1096_v32 }
0x1a32   :  { %1251 = dma.vmem_to_hbm [thread:$0]  %s1247_s15, 32, %s1249_s18, [#allocation11]  }
0x1a33   :  { %v974_v21 = vsel %vm969_vm0, %v2241_v25, %v972_v19  ;;  %v998_v25 = vld [vmem:[#allocation7 + $0x118] sm:$0xff]  ;;  %1127 = vmatpush.msrb.mxu0 %v1095_v15 }
0x1a34   :  { %976 = vrot.lane.b32.xlu1 %v974_v21, %s1974_s2  ;;  %1040 = vmatpush.msra.mxu2 %v998_v25 }
0x1a35   :  { %1062 = vmatpush.msra.mxu3 %v998_v25  ;;  %1136 = vmatpush.msrb.mxu1 %v998_v25 }
0x1a36   :  { %1041 = vmatpush.msra.mxu2 %v997_v27 }
0x1a37   :  { %1063 = vmatpush.msra.mxu3 %v997_v27  ;;  %1137 = vmatpush.msrb.mxu1 %v997_v27 }
0x1a38   :  { %1042 = vmatpush.msra.mxu2 %v996_v14 }
0x1a39   :  { %1064 = vmatpush.msra.mxu3 %v996_v14  ;;  %1138 = vmatpush.msrb.mxu1 %v996_v14 }
0x1a3a   :  { %1043 = vmatpush.msra.mxu2 %v995_v28 }
0x1a3b   :  { %1065 = vmatpush.msra.mxu3 %v995_v28  ;;  %1139 = vmatpush.msrb.mxu1 %v995_v28 }
0x1a3c   :  { %1044 = vmatpush.msra.mxu2 %v994_v29 }
0x1a3d   :  { %1066 = vmatpush.msra.mxu3 %v994_v29  ;;  %1140 = vmatpush.msrb.mxu1 %v994_v29 }
0x1a3e   :  { %1045 = vmatpush.msra.mxu2 %v993_v30 }
0x1a3f   :  { %1067 = vmatpush.msra.mxu3 %v993_v30  ;;  %1141 = vmatpush.msrb.mxu1 %v993_v30 }
0x1a40   :  { %1046 = vmatpush.msra.mxu2 %v992_v31 }
0x1a41   :  { %1068 = vmatpush.msra.mxu3 %v992_v31  ;;  %1142 = vmatpush.msrb.mxu1 %v992_v31 }
0x1a42   :  { %1047 = vmatpush.msra.mxu2 %v991_v35 }
0x1a43   :  { %1069 = vmatpush.msra.mxu3 %v991_v35  ;;  %1143 = vmatpush.msrb.mxu1 %v991_v35 }
0x1a44   :  { %1048 = vmatpush.msra.mxu2 %v990_v39 }
0x1a45   :  { %1070 = vmatpush.msra.mxu3 %v990_v39  ;;  %1144 = vmatpush.msrb.mxu1 %v990_v39 }
0x1a46   :  { %1049 = vmatpush.msra.mxu2 %v989_v41 }
0x1a47   :  { %1071 = vmatpush.msra.mxu3 %v989_v41  ;;  %1145 = vmatpush.msrb.mxu1 %v989_v41 }
0x1a48   :  { %1050 = vmatpush.msra.mxu2 %v988_v45 }
0x1a49   :  { %1072 = vmatpush.msra.mxu3 %v988_v45  ;;  %1146 = vmatpush.msrb.mxu1 %v988_v45 }
0x1a4a   :  { %1051 = vmatpush.msra.mxu2 %v987_v26 }
0x1a4b   :  { %1073 = vmatpush.msra.mxu3 %v987_v26  ;;  %1147 = vmatpush.msrb.mxu1 %v987_v26 }
0x1a4c   :  { %1154 = vmatpush.msrb.mxu2 %v2281_v24  ;;  %v1206_v24 = vld [vmem:[#allocation7 + $0x1b8] sm:$0xff] }
0x1a4d   :  { %1208 = vmatpush.msrb.mxu3 %v1206_v24 }
0x1a4e   :  { %1155 = vmatpush.msrb.mxu2 %v2283_v38  ;;  %v1205_v38 = vld [vmem:[#allocation7 + $0x1b0] sm:$0xff] }
0x1a4f   :  { %1209 = vmatpush.msrb.mxu3 %v1205_v38 }
0x1a50   :  { %1156 = vmatpush.msrb.mxu2 %v2287_v7  ;;  %v1204_v7 = vld [vmem:[#allocation7 + $0x1a8] sm:$0xff] }
0x1a51   :  { %1210 = vmatpush.msrb.mxu3 %v1204_v7 }
0x1a52   :  { %1157 = vmatpush.msrb.mxu2 %v2292_v10  ;;  %v1203_v10 = vld [vmem:[#allocation7 + $0x1a0] sm:$0xff] }
0x1a53   :  { %1211 = vmatpush.msrb.mxu3 %v1203_v10 }
0x1a54   :  { %1158 = vmatpush.msrb.mxu2 %v998_v25  ;;  %v1202_v25 = vld [vmem:[#allocation7 + $0x198] sm:$0xff] }
0x1a55   :  { %1212 = vmatpush.msrb.mxu3 %v1202_v25 }
0x1a56   :  { %1159 = vmatpush.msrb.mxu2 %v997_v27  ;;  %v1201_v27 = vld [vmem:[#allocation7 + $0x190] sm:$0xff] }
0x1a57   :  { %1213 = vmatpush.msrb.mxu3 %v1201_v27 }
0x1a58   :  { %1160 = vmatpush.msrb.mxu2 %v996_v14  ;;  %v1200_v14 = vld [vmem:[#allocation7 + $0x188] sm:$0xff] }
0x1a59   :  { %1214 = vmatpush.msrb.mxu3 %v1200_v14 }
0x1a5a   :  { %1161 = vmatpush.msrb.mxu2 %v995_v28  ;;  %v1199_v28 = vld [vmem:[#allocation7 + $0x180] sm:$0xff] }
0x1a5b   :  { %1215 = vmatpush.msrb.mxu3 %v1199_v28 }
0x1a5c   :  { %1162 = vmatpush.msrb.mxu2 %v994_v29  ;;  %v1198_v29 = vld [vmem:[#allocation7 + $0x178] sm:$0xff] }
0x1a5d   :  { %1216 = vmatpush.msrb.mxu3 %v1198_v29 }
0x1a5e   :  { %1163 = vmatpush.msrb.mxu2 %v993_v30  ;;  %v1197_v30 = vld [vmem:[#allocation7 + $0x170] sm:$0xff] }
0x1a5f   :  { %1217 = vmatpush.msrb.mxu3 %v1197_v30 }
0x1a60   :  { %1164 = vmatpush.msrb.mxu2 %v992_v31  ;;  %v1196_v31 = vld [vmem:[#allocation7 + $0x168] sm:$0xff] }
0x1a61   :  { %1218 = vmatpush.msrb.mxu3 %v1196_v31 }
0x1a62   :  { %1165 = vmatpush.msrb.mxu2 %v991_v35  ;;  %v1195_v35 = vld [vmem:[#allocation7 + $0x160] sm:$0xff] }
0x1a63   :  { %1219 = vmatpush.msrb.mxu3 %v1195_v35 }
0x1a64   :  { %1166 = vmatpush.msrb.mxu2 %v990_v39  ;;  %v1194_v39 = vld [vmem:[#allocation7 + $0x158] sm:$0xff] }
0x1a65   :  { %1220 = vmatpush.msrb.mxu3 %v1194_v39 }
0x1a66   :  { %1167 = vmatpush.msrb.mxu2 %v989_v41  ;;  %v1192_v41 = vld [vmem:[#allocation7 + $0x148] sm:$0xff] }
0x1a67   :  { %1221 = vmatpush.msrb.mxu3 %v1193_v40 }
0x1a68   :  { %1168 = vmatpush.msrb.mxu2 %v988_v45 }
0x1a69   :  { %1222 = vmatpush.msrb.mxu3 %v1192_v41 }
0x1a6a   :  { %1169 = vmatpush.msrb.mxu2 %v987_v26 }
0x1aa6   :  { %v977_v43 = vpop.permute.xlu1 %976 }
0x1aa7   :  { %v979_v44 = vsel %vm107_vm2, %v970_v42, %v977_v43  ;;  %v1191_v42 = vld [vmem:[#allocation7 + $0x140] sm:$0xff] }
0x1aa8   :  { %1360 = vmatmul.msk.f32.vlgmr.msra.gmra.mxu1 %vm1012_vm11, %v979_v44  ;;  %1223 = vmatpush.msrb.mxu3 %v1191_v42 }
0x1b25   :  { %v1033_v46 = vpop.f32.mrf.mxu1 }
0x1b26   :  { %v1034_v47 = vadd.f32 %v1627_v37, %v1033_v46 }
0x1b28   :  { %1052 = vmatmul.f32.vlgmr.msra.gmra.mxu2 %v1034_v47 }
0x1bab   :  { %v1053_v48 = vpop.f32.mrf.mxu2 }
0x1bac   :  { %v1056_v49 = vsub.f32 %v1034_v47, %v1053_v48 }
0x1bae   :  { %v1057_v50 = vmul.f32 %v1056_v49, %v1056_v49 }
0x1bb0   :  { %1074 = vmatmul.f32.vlgmr.msra.gmra.mxu3 %v1057_v50 }
0x1c33   :  { %v1075_v16 = vpop.f32.mrf.mxu3 }
0x1c34   :  { %v1076_v58 = vadd.f32 1e-05, %v1075_v16 }
0x1c36   :  { %1636 = vrsqrt.f32 %v1076_v58  ;;  %vm1084_vm1 = vweird.f32 %v1076_v58 }
0x1c3c   :  { %v1637_v22 = vpop.eup %1636 }
0x1c3d   :  { %v1079_v59 = vmul.f32 %v1637_v22, %v1076_v58  ;;  %vm1085_vm2 = vweird.f32 %v1637_v22 }
0x1c3e   :  { %vm1086_vm3 = vmor %vm1084_vm1, %vm1085_vm2 }
0x1c3f   :  { %v1080_v60 = vmul.f32 %v1637_v22, %v1079_v59 }
0x1c41   :  { %v1081_v61 = vmul.f32 0.5, %v1080_v60 }
0x1c43   :  { %v1082_v62 = vsub.f32 1.5, %v1081_v61 }
0x1c45   :  { %v1083_v63 = vmul.f32 %v1637_v22, %v1082_v62 }
0x1c47   :  { %v1087_v1 = vsel %vm1086_vm3, %v1637_v22, %v1083_v63 }
0x1c48   :  { %v1088_v2 = vmul.f32 %v1087_v1, %v1056_v49  ;;  %v1631_v49 = vld [vmem:[#allocation6 + $0x10] ss:$0 sm:$0xff] }
0x1c4a   :  { %v1090_v3 = vmul.f32 %v1628_v0, %v1088_v2 }
0x1c4c   :  { %v1092_v20 = vadd.f32 %v1629_v18, %v1090_v3 }
0x1c4e   :  { %v1093_v4 = vmul.f32 0.01, %v1092_v20 }
0x1c50   :  { %v1094_v5 = vmax.f32 %v1092_v20, %v1093_v4 }
0x1c52   :  { %1128 = vmatmul.f32.vlgmr.msrb.gmra.mxu0 %v1094_v5 }
0x1ccf   :  { %v1129_v8 = vpop.f32.mrf.mxu0 }
0x1cd0   :  { %v1130_v17 = vadd.f32 %v1630_v6, %v1129_v8 }
0x1cd2   :  { %1148 = vmatmul.f32.vlgmr.msrb.gmra.mxu1 %v1130_v17 }
0x1d4f   :  { %v1149_v19 = vpop.f32.mrf.mxu1 }
0x1d50   :  { %v1152_v21 = vsub.f32 %v1130_v17, %v1149_v19 }
0x1d52   :  { %v1153_v23 = vmul.f32 %v1152_v21, %v1152_v21 }
0x1d54   :  { %1170 = vmatmul.f32.vlgmr.msrb.gmra.mxu2 %v1153_v23 }
0x1dd7   :  { %v1171_v43 = vpop.f32.mrf.mxu2 }
0x1dd8   :  { %v1172_v44 = vadd.f32 1e-05, %v1171_v43 }
0x1dda   :  { %1638 = vrsqrt.f32 %v1172_v44  ;;  %vm1180_vm5 = vweird.f32 %v1172_v44 }
0x1de0   :  { %v1639_v45 = vpop.eup %1638 }
0x1de1   :  { %v1175_v26 = vmul.f32 %v1639_v45, %v1172_v44  ;;  %vm1181_vm4 = vweird.f32 %v1639_v45 }
0x1de2   :  { %vm1182_vm6 = vmor %vm1180_vm5, %vm1181_vm4 }
0x1de3   :  { %v1176_v37 = vmul.f32 %v1639_v45, %v1175_v26 }
0x1de5   :  { %v1177_v46 = vmul.f32 0.5, %v1176_v37 }
0x1de7   :  { %v1178_v47 = vsub.f32 1.5, %v1177_v46 }
0x1de9   :  { %v1179_v48 = vmul.f32 %v1639_v45, %v1178_v47 }
0x1deb   :  { %v1183_v50 = vsel %vm1182_vm6, %v1639_v45, %v1179_v48 }
0x1dec   :  { %v1184_v51 = vmul.f32 %v1183_v50, %v1152_v21 }
0x1dee   :  { %v1186_v53 = vmul.f32 %v1631_v49, %v1184_v51 }
0x1df0   :  { %v1188_v54 = vadd.f32 %v1632_v52, %v1186_v53 }
0x1df2   :  { %v1189_v55 = vmul.f32 0.01, %v1188_v54 }
0x1df4   :  { %v1190_v56 = vmax.f32 %v1188_v54, %v1189_v55 }
0x1df6   :  { %1224 = vmatmul.f32.vlgmr.msrb.gmra.mxu3 %v1190_v56 }
0x1e79   :  { %v1225_v9 = vpop.f32.mrf.mxu3 }
0x1e7a   :  { %v1226_v11 = vadd.f32 %v1633_v57, %v1225_v9 }
0x1e7c   :  { %1229 = vst.msk [vmem:[#allocation9] sm:$0xf] %vm1228_vm7, %v1226_v11 }
0x1e7d   :  { %1240 = dma.vmem_to_hbm [thread:$0]  %s1236_s20, 64, %s1238_s23, [#allocation4]  }
0x1e7e   :  { %1850 = dma.done.wait [#allocation4], 64  }
0x1e7f   :  { %1851 = vsyncadd [#allocation4], 4294967232 }
0x1e80   :  { %1852 = dma.done.wait [#allocation11], 32  }
0x1e81   :  { %1853 = vsyncadd [#allocation11], 4294967264 }
0x1e82   :  { %1260 = vsyncpa [#allocation3], 1 }
0x1e83   :  { %1261 = vsyncpa [#allocation8], 1 }
0x1e84   :  { %1262 = vsyncpa [#allocation4], 1 }
0x1e85   :  { %1263 = vsyncpa [#allocation11], 1 }
0x1e86   :  { %1264 = vsyncpa [#allocation5], 1 }

</bundles_post_ra>
